<compile_context>
chip_gen: v7x
topology: tpu7x:2x2x1
jax: 0.10.0
libtpu: 0.0.40
codegen_flags: <defaults>
</compile_context>

<pallas_src>
import functools

import jax
import jax.numpy as jnp
from jax import lax
from jax.experimental import pallas as pl
from jax.experimental.pallas import tpu as pltpu


def _round_up(x, m):
    return ((x + m - 1) // m) * m


def _sigmoid(x):
    # Single tanh EUP pass instead of exp + divide.
    return 0.5 * jnp.tanh(0.5 * x) + 0.5


def _lstm_chunk_kernel(xproj_ref, whh_ref, h0_ref, c0_ref,
                       hseq_ref, hn_ref, cn_ref, h_scr, c_scr,
                       *, hidden_pad, chunk, seq_len, guard_tail):
    """One (batch-block, time-chunk) grid step of the LSTM recurrence.

    xproj_ref : (Tc, Bb, 4*Hp) bf16   precomputed x @ W_ih^T + bias, gate-major
    whh_ref   : (Hp, 4*Hp)     bf16   W_hh^T, gate blocks lane-aligned
    h0_ref, c0_ref : (Bb, Hp)  f32
    hseq_ref  : (Tc, Bb, Hp)   bf16   hidden states of this chunk
    hn_ref, cn_ref : (Bb, Hp)  f32    final state (written on last chunk)
    h_scr, c_scr   : (Bb, Hp)  f32    carry across time-chunks (VMEM scratch)
    """
    Hp = hidden_pad
    t_blk = pl.program_id(1)

    @pl.when(t_blk == 0)
    def _():
        h_scr[...] = h0_ref[...]
        c_scr[...] = c0_ref[...]

    def step(t, carry):
        h, c = carry
        # Single per-step MXU dot (bf16 operands, f32 accumulation); the
        # x-projection was hoisted to the wrapper and streams in as bf16.
        gates = xproj_ref[t].astype(jnp.float32) + jnp.dot(
            h.astype(jnp.bfloat16), whh_ref[...],
            preferred_element_type=jnp.float32)
        # Gate slices start at lane offsets 0, Hp, 2Hp, 3Hp (multiples of 128).
        i_g = _sigmoid(gates[:, 0 * Hp:1 * Hp])
        f_g = _sigmoid(gates[:, 1 * Hp:2 * Hp])
        g_g = jnp.tanh(gates[:, 2 * Hp:3 * Hp])
        o_g = _sigmoid(gates[:, 3 * Hp:4 * Hp])
        c_new = f_g * c + i_g * g_g
        h_new = o_g * jnp.tanh(c_new)
        if guard_tail:
            # Time axis was padded to a multiple of the chunk; freeze the carry
            # on padded steps so h_n / c_n stay correct.
            valid = (t_blk * chunk + t) < seq_len
            h_new = jnp.where(valid, h_new, h)
            c_new = jnp.where(valid, c_new, c)
        hseq_ref[t] = h_new.astype(hseq_ref.dtype)
        return h_new, c_new

    unroll = True if chunk <= 32 else 4
    h_fin, c_fin = lax.fori_loop(0, chunk, step,
                                 (h_scr[...], c_scr[...]), unroll=unroll)
    h_scr[...] = h_fin
    c_scr[...] = c_fin

    @pl.when(t_blk == pl.num_programs(1) - 1)
    def _():
        hn_ref[...] = h_fin
        cn_ref[...] = c_fin


def merlin_forward(com, h0, c0, params, *, stream_dtype=jnp.bfloat16):
    """com: (T, B, io) f32 time-major; h0/c0: (1, B, H).

    Returns (out, (h_n, c_n)) with out: (T, B, io), h_n/c_n: (1, B, H).
    """
    T, B, E = com.shape
    H = h0.shape[-1]
    O = params["w_lin"].shape[0]

    Hp = _round_up(H, 128)   # lane-aligned gate blocks
    Bp = _round_up(B, 8)     # sublane-aligned batch

    # v7x: 2 TensorCores per chip -> split the batch over a 'parallel' grid axis
    # when each half stays bf16-pack aligned (>= 16 sublanes). No-op on v5e/v6e.
    n_b = 2 if (Bp % 32 == 0) else 1
    Bb = Bp // n_b

    # ---- Padded, gate-block-aligned parameters (built once, in the wrapper). ----
    w_ih = params["w_ih"]                    # (4H, E)  PyTorch layout
    w_hh = params["w_hh"]                    # (4H, H)
    bias = params["b_ih"] + params["b_hh"]   # pre-summed bias (4H,)

    w_ih_g = jnp.pad(w_ih.reshape(4, H, E), ((0, 0), (0, Hp - H), (0, 0)))
    wih_t = jnp.transpose(w_ih_g, (2, 0, 1)).reshape(E, 4 * Hp)        # (E, 4Hp)
    bias_p = jnp.pad(bias.reshape(4, H), ((0, 0), (0, Hp - H))).reshape(4 * Hp)

    w_hh_g = jnp.pad(w_hh.reshape(4, H, H), ((0, 0), (0, Hp - H), (0, Hp - H)))
    whh_t = jnp.transpose(w_hh_g, (2, 0, 1)).reshape(Hp, 4 * Hp)       # (Hp, 4Hp)
    whh_t = whh_t.astype(jnp.bfloat16)

    # ---- Hoisted input projection: one big XLA matmul, emitted directly in the
    #      padded (T, Bp, 4*Hp) layout (no post-matmul pad/reshape pass). ----
    com_p = jnp.pad(com, ((0, 0), (0, Bp - B), (0, 0)))                # (T, Bp, E)
    xproj = (com_p.reshape(T * Bp, E) @ wih_t + bias_p).astype(stream_dtype)
    xproj = xproj.reshape(T, Bp, 4 * Hp)

    # ---- Time-chunk size: keep double-buffered streamed blocks + weights well
    #      under v7x's 64 MiB physical VMEM (and every generation's scoped limit).
    stream_bytes = jnp.dtype(stream_dtype).itemsize
    per_step = 2 * (Bb * 4 * Hp + Bb * Hp) * stream_bytes   # dbl-buffered in + out
    Tc = int(max(1, min(T, (20 << 20) // per_step)))
    nT = pl.cdiv(T, Tc)
    T_pad = nT * Tc
    guard_tail = T_pad != T
    if guard_tail:
        xproj = jnp.pad(xproj, ((0, T_pad - T), (0, 0), (0, 0)))

    h0p = jnp.pad(h0[0], ((0, Bp - B), (0, Hp - H)))
    c0p = jnp.pad(c0[0], ((0, Bp - B), (0, Hp - H)))

    kernel = functools.partial(_lstm_chunk_kernel, hidden_pad=Hp, chunk=Tc,
                               seq_len=T, guard_tail=guard_tail)

    vmem_limit = 48 * 1024 * 1024   # > default scoped limits, < v7x physical 64MiB

    hseq_p, hn_p, cn_p = pl.pallas_call(
        kernel,
        out_shape=(jax.ShapeDtypeStruct((T_pad, Bp, Hp), stream_dtype),
                   jax.ShapeDtypeStruct((Bp, Hp), jnp.float32),
                   jax.ShapeDtypeStruct((Bp, Hp), jnp.float32)),
        grid_spec=pltpu.PrefetchScalarGridSpec(
            num_scalar_prefetch=0,
            grid=(n_b, nT),
            in_specs=[
                pl.BlockSpec((Tc, Bb, 4 * Hp), lambda b, t: (t, b, 0)),  # xproj
                pl.BlockSpec((Hp, 4 * Hp), lambda b, t: (0, 0)),         # whh
                pl.BlockSpec((Bb, Hp), lambda b, t: (b, 0)),             # h0
                pl.BlockSpec((Bb, Hp), lambda b, t: (b, 0)),             # c0
            ],
            out_specs=(
                pl.BlockSpec((Tc, Bb, Hp), lambda b, t: (t, b, 0)),      # hseq
                pl.BlockSpec((Bb, Hp), lambda b, t: (b, 0)),             # h_n
                pl.BlockSpec((Bb, Hp), lambda b, t: (b, 0)),             # c_n
            ),
            scratch_shapes=[pltpu.VMEM((Bb, Hp), jnp.float32),           # h carry
                            pltpu.VMEM((Bb, Hp), jnp.float32)],          # c carry
        ),
        compiler_params=pltpu.CompilerParams(
            dimension_semantics=("parallel", "arbitrary"),
            vmem_limit_bytes=vmem_limit),
    )(xproj, whh_t, h0p, c0p)

    hseq = hseq_p[:T, :B, :H].astype(jnp.float32)          # (T, B, H)
    h_n = hn_p[:B, :H][None]                               # (1, B, H)
    c_n = cn_p[:B, :H][None]                               # (1, B, H)

    # ---- Hoisted output Linear over all time steps (parallel, XLA). ----
    out = hseq.reshape(T * B, H) @ params["w_lin"].T + params["b_lin"]
    out = out.reshape(T, B, O)
    return out, (h_n, c_n)


def init_params(key, io_size, hidden_size):
    """Deterministic init mirroring Merlin.__init__ (gate order i,f,g,o)."""
    H, E = hidden_size, io_size
    ks = jax.random.split(key, 9)
    orth = jax.nn.initializers.orthogonal()
    xav = jax.nn.initializers.glorot_uniform()

    # per-gate orthogonal (hh) / xavier-uniform (ih)
    w_hh = jnp.concatenate(
        [orth(ks[g], (H, H), jnp.float32) for g in range(4)], axis=0)     # (4H, H)
    w_ih = jnp.concatenate(
        [xav(ks[4 + g], (H, E), jnp.float32) for g in range(4)], axis=0)  # (4H, E)

    # biases zero; forget-gate block (index 1) set to 1.0 in BOTH biases
    b_ih = jnp.zeros((4 * H,), jnp.float32).at[H:2 * H].set(1.0)
    b_hh = jnp.zeros((4 * H,), jnp.float32).at[H:2 * H].set(1.0)

    # Linear: xavier-uniform weight, zero bias
    w_lin = xav(ks[8], (E, H), jnp.float32)                               # (O=E, H)
    b_lin = jnp.zeros((E,), jnp.float32)

    return dict(w_ih=w_ih, w_hh=w_hh, b_ih=b_ih, b_hh=b_hh,
                w_lin=w_lin, b_lin=b_lin)


def reference_forward(com, h0, c0, params):
    """Pure-JAX f32 reference of the same forward pass (for verification)."""
    H = h0.shape[-1]

    def step(carry, xt):
        h, c = carry
        gates = (xt @ params["w_ih"].T + params["b_ih"]
                 + h @ params["w_hh"].T + params["b_hh"])
        i = jax.nn.sigmoid(gates[:, 0 * H:1 * H])
        f = jax.nn.sigmoid(gates[:, 1 * H:2 * H])
        g = jnp.tanh(gates[:, 2 * H:3 * H])
        o = jax.nn.sigmoid(gates[:, 3 * H:4 * H])
        c_new = f * c + i * g
        h_new = o * jnp.tanh(c_new)
        return (h_new, c_new), h_new

    (h_n, c_n), hseq = jax.lax.scan(step, (h0[0], c0[0]), com)
    out = hseq @ params["w_lin"].T + params["b_lin"]
    return out, (h_n[None], c_n[None])


if __name__ == "__main__":
    io_size, hidden_size = 16, 32
    T, B = 8, 2

    key = jax.random.PRNGKey(0)
    k_par, k_com, k_h, k_c = jax.random.split(key, 4)

    params = init_params(k_par, io_size, hidden_size)
    com = jax.random.normal(k_com, (T, B, io_size), jnp.float32)
    h0 = 0.1 * jax.random.normal(k_h, (1, B, hidden_size), jnp.float32)
    c0 = 0.1 * jax.random.normal(k_c, (1, B, hidden_size), jnp.float32)

    out, (h_n, c_n) = merlin_forward(com, h0, c0, params)
    out = jax.block_until_ready(out)
    h_n = jax.block_until_ready(h_n)
    c_n = jax.block_until_ready(c_n)

    ref_out, (ref_h, ref_c) = reference_forward(com, h0, c0, params)

    assert out.shape == (T, B, io_size)
    assert h_n.shape == (1, B, hidden_size) and c_n.shape == (1, B, hidden_size)
    # bf16 streamed xproj/hseq + bf16 MXU operands (f32 accumulation / gate math)
    # -> tolerances loosened vs the all-f32 reference, as flagged in the review.
    assert jnp.allclose(out, ref_out, atol=5e-2, rtol=5e-2), "out mismatch vs reference"
    assert jnp.allclose(h_n, ref_h, atol=5e-2, rtol=5e-2), "h_n mismatch vs reference"
    assert jnp.allclose(c_n, ref_c, atol=5e-2, rtol=5e-2), "c_n mismatch vs reference"

    print("KERNEL_OK")
</pallas_src>

<mosaic_0001>
module attributes {stable_mosaic.version = 11 : i64} {
  func.func @_lstm_chunk_kernel(%arg0: i32, %arg1: i32, %arg2: memref<8x8x512xbf16, #tpu.memory_space<vmem>>, %arg3: memref<128x512xbf16, #tpu.memory_space<vmem>>, %arg4: memref<8x128xf32, #tpu.memory_space<vmem>>, %arg5: memref<8x128xf32, #tpu.memory_space<vmem>>, %arg6: memref<8x8x128xbf16, #tpu.memory_space<vmem>>, %arg7: memref<8x128xf32, #tpu.memory_space<vmem>>, %arg8: memref<8x128xf32, #tpu.memory_space<vmem>>, %arg9: memref<8x128xf32, #tpu.memory_space<vmem>>, %arg10: memref<8x128xf32, #tpu.memory_space<vmem>>) attributes {dimension_semantics = [#tpu.dimension_semantics<parallel>, #tpu.dimension_semantics<arbitrary>], iteration_bounds = array<i64: 1, 1>, scalar_prefetch = 0 : i64, scratch_operands = 2 : i64, tpu.core_type = #tpu.core_type<tc>, window_params = [{transform_indices = @transform_0, window_bounds = array<i64: 8, 8, 512>}, {pipeline_mode = #tpu.pipeline_mode<synchronous>, transform_indices = @transform_1, window_bounds = array<i64: 128, 512>}, {transform_indices = @transform_2, window_bounds = array<i64: 8, 128>}, {transform_indices = @transform_3, window_bounds = array<i64: 8, 128>}, {transform_indices = @transform_4, window_bounds = array<i64: 8, 8, 128>}, {transform_indices = @transform_5, window_bounds = array<i64: 8, 128>}, {transform_indices = @transform_6, window_bounds = array<i64: 8, 128>}]} {
    %c0_i32 = arith.constant 0 : i32
    %0 = arith.cmpi eq, %arg1, %c0_i32 : i32
    %1 = arith.extui %0 : i1 to i32
    %c0_i32_0 = arith.constant 0 : i32
    %2 = arith.cmpi ne, %1, %c0_i32_0 : i32
    scf.if %2 {
      %c0_138 = arith.constant 0 : index
      %c0_139 = arith.constant 0 : index
      %362 = vector.load %arg4[%c0_138, %c0_139] : memref<8x128xf32, #tpu.memory_space<vmem>>, vector<8x128xf32>
      %c0_140 = arith.constant 0 : index
      %c0_141 = arith.constant 0 : index
      %363 = vector.load %arg9[%c0_140, %c0_141] : memref<8x128xf32, #tpu.memory_space<vmem>>, vector<8x128xf32>
      tpu.vector_store %arg9[%c0_140, %c0_141], %362 {strides = array<i32>} : memref<8x128xf32, #tpu.memory_space<vmem>>, vector<8x128xf32>,
      %c0_142 = arith.constant 0 : index
      %c0_143 = arith.constant 0 : index
      %364 = vector.load %arg5[%c0_142, %c0_143] : memref<8x128xf32, #tpu.memory_space<vmem>>, vector<8x128xf32>
      %c0_144 = arith.constant 0 : index
      %c0_145 = arith.constant 0 : index
      %365 = vector.load %arg10[%c0_144, %c0_145] : memref<8x128xf32, #tpu.memory_space<vmem>>, vector<8x128xf32>
      tpu.vector_store %arg10[%c0_144, %c0_145], %364 {strides = array<i32>} : memref<8x128xf32, #tpu.memory_space<vmem>>, vector<8x128xf32>,
    } else {
    }
    %c0 = arith.constant 0 : index
    %c0_1 = arith.constant 0 : index
    %3 = vector.load %arg9[%c0, %c0_1] : memref<8x128xf32, #tpu.memory_space<vmem>>, vector<8x128xf32>
    %c0_2 = arith.constant 0 : index
    %c0_3 = arith.constant 0 : index
    %4 = vector.load %arg10[%c0_2, %c0_3] : memref<8x128xf32, #tpu.memory_space<vmem>>, vector<8x128xf32>
    %c0_i32_4 = arith.constant 0 : i32
    %5 = arith.index_cast %c0_i32_4 : i32 to index
    %c0_5 = arith.constant 0 : index
    %c0_6 = arith.constant 0 : index
    %6 = vector.load %arg2[%5, %c0_5, %c0_6] : memref<8x8x512xbf16, #tpu.memory_space<vmem>>, vector<1x8x512xbf16>
    %7 = vector.shape_cast %6 : vector<1x8x512xbf16> to vector<8x512xbf16>
    %8 = arith.extf %7 : vector<8x512xbf16> to vector<8x512xf32>
    %9 = arith.truncf %3 : vector<8x128xf32> to vector<8x128xbf16>
    %c0_7 = arith.constant 0 : index
    %c0_8 = arith.constant 0 : index
    %10 = vector.load %arg3[%c0_7, %c0_8] : memref<128x512xbf16, #tpu.memory_space<vmem>>, vector<128x512xbf16>
    %cst = arith.constant dense<0.000000e+00> : vector<8x512xf32>
    %11 = tpu.matmul %9, %10, %cst {dimension_numbers = #tpu.dot_dimension_numbers<[1], [0], [0], [1], [0, 0, 1, 1], [], []>} : vector<8x128xbf16>, vector<128x512xbf16>, vector<8x512xf32> -> vector<8x512xf32>
    %12 = arith.addf %8, %11 : vector<8x512xf32>
    %13 = vector.extract_strided_slice %12 {offsets = [0, 0], sizes = [8, 128], strides = [1, 1]} : vector<8x512xf32> to vector<8x128xf32>
    %cst_9 = arith.constant 5.000000e-01 : f32
    %14 = vector.broadcast %cst_9 : f32 to vector<8x128xf32>
    %15 = arith.mulf %14, %13 : vector<8x128xf32>
    %16 = math.tanh %15 : vector<8x128xf32>
    %cst_10 = arith.constant 5.000000e-01 : f32
    %17 = vector.broadcast %cst_10 : f32 to vector<8x128xf32>
    %18 = arith.mulf %17, %16 : vector<8x128xf32>
    %cst_11 = arith.constant 5.000000e-01 : f32
    %19 = vector.broadcast %cst_11 : f32 to vector<8x128xf32>
    %20 = arith.addf %18, %19 : vector<8x128xf32>
    %21 = vector.extract_strided_slice %12 {offsets = [0, 128], sizes = [8, 128], strides = [1, 1]} : vector<8x512xf32> to vector<8x128xf32>
    %cst_12 = arith.constant 5.000000e-01 : f32
    %22 = vector.broadcast %cst_12 : f32 to vector<8x128xf32>
    %23 = arith.mulf %22, %21 : vector<8x128xf32>
    %24 = math.tanh %23 : vector<8x128xf32>
    %cst_13 = arith.constant 5.000000e-01 : f32
    %25 = vector.broadcast %cst_13 : f32 to vector<8x128xf32>
    %26 = arith.mulf %25, %24 : vector<8x128xf32>
    %cst_14 = arith.constant 5.000000e-01 : f32
    %27 = vector.broadcast %cst_14 : f32 to vector<8x128xf32>
    %28 = arith.addf %26, %27 : vector<8x128xf32>
    %29 = vector.extract_strided_slice %12 {offsets = [0, 256], sizes = [8, 128], strides = [1, 1]} : vector<8x512xf32> to vector<8x128xf32>
    %30 = math.tanh %29 : vector<8x128xf32>
    %31 = vector.extract_strided_slice %12 {offsets = [0, 384], sizes = [8, 128], strides = [1, 1]} : vector<8x512xf32> to vector<8x128xf32>
    %cst_15 = arith.constant 5.000000e-01 : f32
    %32 = vector.broadcast %cst_15 : f32 to vector<8x128xf32>
    %33 = arith.mulf %32, %31 : vector<8x128xf32>
    %34 = math.tanh %33 : vector<8x128xf32>
    %cst_16 = arith.constant 5.000000e-01 : f32
    %35 = vector.broadcast %cst_16 : f32 to vector<8x128xf32>
    %36 = arith.mulf %35, %34 : vector<8x128xf32>
    %cst_17 = arith.constant 5.000000e-01 : f32
    %37 = vector.broadcast %cst_17 : f32 to vector<8x128xf32>
    %38 = arith.addf %36, %37 : vector<8x128xf32>
    %39 = arith.mulf %28, %4 : vector<8x128xf32>
    %40 = arith.mulf %20, %30 : vector<8x128xf32>
    %41 = arith.addf %39, %40 : vector<8x128xf32>
    %42 = math.tanh %41 : vector<8x128xf32>
    %43 = arith.mulf %38, %42 : vector<8x128xf32>
    %44 = arith.truncf %43 : vector<8x128xf32> to vector<8x128xbf16>
    %45 = arith.index_cast %c0_i32_4 : i32 to index
    %c0_18 = arith.constant 0 : index
    %c0_19 = arith.constant 0 : index
    %46 = vector.load %arg6[%45, %c0_18, %c0_19] : memref<8x8x128xbf16, #tpu.memory_space<vmem>>, vector<1x8x128xbf16>
    %47 = vector.shape_cast %46 : vector<1x8x128xbf16> to vector<8x128xbf16>
    %48 = vector.shape_cast %44 : vector<8x128xbf16> to vector<1x8x128xbf16>
    tpu.vector_store %arg6[%45, %c0_18, %c0_19], %48 {strides = array<i32>} : memref<8x8x128xbf16, #tpu.memory_space<vmem>>, vector<1x8x128xbf16>,
    %c1_i32 = arith.constant 1 : i32
    %49 = arith.index_cast %c1_i32 : i32 to index
    %c0_20 = arith.constant 0 : index
    %c0_21 = arith.constant 0 : index
    %50 = vector.load %arg2[%49, %c0_20, %c0_21] : memref<8x8x512xbf16, #tpu.memory_space<vmem>>, vector<1x8x512xbf16>
    %51 = vector.shape_cast %50 : vector<1x8x512xbf16> to vector<8x512xbf16>
    %52 = arith.extf %51 : vector<8x512xbf16> to vector<8x512xf32>
    %53 = arith.truncf %43 : vector<8x128xf32> to vector<8x128xbf16>
    %c0_22 = arith.constant 0 : index
    %c0_23 = arith.constant 0 : index
    %54 = vector.load %arg3[%c0_22, %c0_23] : memref<128x512xbf16, #tpu.memory_space<vmem>>, vector<128x512xbf16>
    %cst_24 = arith.constant dense<0.000000e+00> : vector<8x512xf32>
    %55 = tpu.matmul %53, %54, %cst_24 {dimension_numbers = #tpu.dot_dimension_numbers<[1], [0], [0], [1], [0, 0, 1, 1], [], []>} : vector<8x128xbf16>, vector<128x512xbf16>, vector<8x512xf32> -> vector<8x512xf32>
    %56 = arith.addf %52, %55 : vector<8x512xf32>
    %57 = vector.extract_strided_slice %56 {offsets = [0, 0], sizes = [8, 128], strides = [1, 1]} : vector<8x512xf32> to vector<8x128xf32>
    %cst_25 = arith.constant 5.000000e-01 : f32
    %58 = vector.broadcast %cst_25 : f32 to vector<8x128xf32>
    %59 = arith.mulf %58, %57 : vector<8x128xf32>
    %60 = math.tanh %59 : vector<8x128xf32>
    %cst_26 = arith.constant 5.000000e-01 : f32
    %61 = vector.broadcast %cst_26 : f32 to vector<8x128xf32>
    %62 = arith.mulf %61, %60 : vector<8x128xf32>
    %cst_27 = arith.constant 5.000000e-01 : f32
    %63 = vector.broadcast %cst_27 : f32 to vector<8x128xf32>
    %64 = arith.addf %62, %63 : vector<8x128xf32>
    %65 = vector.extract_strided_slice %56 {offsets = [0, 128], sizes = [8, 128], strides = [1, 1]} : vector<8x512xf32> to vector<8x128xf32>
    %cst_28 = arith.constant 5.000000e-01 : f32
    %66 = vector.broadcast %cst_28 : f32 to vector<8x128xf32>
    %67 = arith.mulf %66, %65 : vector<8x128xf32>
    %68 = math.tanh %67 : vector<8x128xf32>
    %cst_29 = arith.constant 5.000000e-01 : f32
    %69 = vector.broadcast %cst_29 : f32 to vector<8x128xf32>
    %70 = arith.mulf %69, %68 : vector<8x128xf32>
    %cst_30 = arith.constant 5.000000e-01 : f32
    %71 = vector.broadcast %cst_30 : f32 to vector<8x128xf32>
    %72 = arith.addf %70, %71 : vector<8x128xf32>
    %73 = vector.extract_strided_slice %56 {offsets = [0, 256], sizes = [8, 128], strides = [1, 1]} : vector<8x512xf32> to vector<8x128xf32>
    %74 = math.tanh %73 : vector<8x128xf32>
    %75 = vector.extract_strided_slice %56 {offsets = [0, 384], sizes = [8, 128], strides = [1, 1]} : vector<8x512xf32> to vector<8x128xf32>
    %cst_31 = arith.constant 5.000000e-01 : f32
    %76 = vector.broadcast %cst_31 : f32 to vector<8x128xf32>
    %77 = arith.mulf %76, %75 : vector<8x128xf32>
    %78 = math.tanh %77 : vector<8x128xf32>
    %cst_32 = arith.constant 5.000000e-01 : f32
    %79 = vector.broadcast %cst_32 : f32 to vector<8x128xf32>
    %80 = arith.mulf %79, %78 : vector<8x128xf32>
    %cst_33 = arith.constant 5.000000e-01 : f32
    %81 = vector.broadcast %cst_33 : f32 to vector<8x128xf32>
    %82 = arith.addf %80, %81 : vector<8x128xf32>
    %83 = arith.mulf %72, %41 : vector<8x128xf32>
    %84 = arith.mulf %64, %74 : vector<8x128xf32>
    %85 = arith.addf %83, %84 : vector<8x128xf32>
    %86 = math.tanh %85 : vector<8x128xf32>
    %87 = arith.mulf %82, %86 : vector<8x128xf32>
    %88 = arith.truncf %87 : vector<8x128xf32> to vector<8x128xbf16>
    %89 = arith.index_cast %c1_i32 : i32 to index
    %c0_34 = arith.constant 0 : index
    %c0_35 = arith.constant 0 : index
    %90 = vector.load %arg6[%89, %c0_34, %c0_35] : memref<8x8x128xbf16, #tpu.memory_space<vmem>>, vector<1x8x128xbf16>
    %91 = vector.shape_cast %90 : vector<1x8x128xbf16> to vector<8x128xbf16>
    %92 = vector.shape_cast %88 : vector<8x128xbf16> to vector<1x8x128xbf16>
    tpu.vector_store %arg6[%89, %c0_34, %c0_35], %92 {strides = array<i32>} : memref<8x8x128xbf16, #tpu.memory_space<vmem>>, vector<1x8x128xbf16>,
    %c2_i32 = arith.constant 2 : i32
    %93 = arith.index_cast %c2_i32 : i32 to index
    %c0_36 = arith.constant 0 : index
    %c0_37 = arith.constant 0 : index
    %94 = vector.load %arg2[%93, %c0_36, %c0_37] : memref<8x8x512xbf16, #tpu.memory_space<vmem>>, vector<1x8x512xbf16>
    %95 = vector.shape_cast %94 : vector<1x8x512xbf16> to vector<8x512xbf16>
    %96 = arith.extf %95 : vector<8x512xbf16> to vector<8x512xf32>
    %97 = arith.truncf %87 : vector<8x128xf32> to vector<8x128xbf16>
    %c0_38 = arith.constant 0 : index
    %c0_39 = arith.constant 0 : index
    %98 = vector.load %arg3[%c0_38, %c0_39] : memref<128x512xbf16, #tpu.memory_space<vmem>>, vector<128x512xbf16>
    %cst_40 = arith.constant dense<0.000000e+00> : vector<8x512xf32>
    %99 = tpu.matmul %97, %98, %cst_40 {dimension_numbers = #tpu.dot_dimension_numbers<[1], [0], [0], [1], [0, 0, 1, 1], [], []>} : vector<8x128xbf16>, vector<128x512xbf16>, vector<8x512xf32> -> vector<8x512xf32>
    %100 = arith.addf %96, %99 : vector<8x512xf32>
    %101 = vector.extract_strided_slice %100 {offsets = [0, 0], sizes = [8, 128], strides = [1, 1]} : vector<8x512xf32> to vector<8x128xf32>
    %cst_41 = arith.constant 5.000000e-01 : f32
    %102 = vector.broadcast %cst_41 : f32 to vector<8x128xf32>
    %103 = arith.mulf %102, %101 : vector<8x128xf32>
    %104 = math.tanh %103 : vector<8x128xf32>
    %cst_42 = arith.constant 5.000000e-01 : f32
    %105 = vector.broadcast %cst_42 : f32 to vector<8x128xf32>
    %106 = arith.mulf %105, %104 : vector<8x128xf32>
    %cst_43 = arith.constant 5.000000e-01 : f32
    %107 = vector.broadcast %cst_43 : f32 to vector<8x128xf32>
    %108 = arith.addf %106, %107 : vector<8x128xf32>
    %109 = vector.extract_strided_slice %100 {offsets = [0, 128], sizes = [8, 128], strides = [1, 1]} : vector<8x512xf32> to vector<8x128xf32>
    %cst_44 = arith.constant 5.000000e-01 : f32
    %110 = vector.broadcast %cst_44 : f32 to vector<8x128xf32>
    %111 = arith.mulf %110, %109 : vector<8x128xf32>
    %112 = math.tanh %111 : vector<8x128xf32>
    %cst_45 = arith.constant 5.000000e-01 : f32
    %113 = vector.broadcast %cst_45 : f32 to vector<8x128xf32>
    %114 = arith.mulf %113, %112 : vector<8x128xf32>
    %cst_46 = arith.constant 5.000000e-01 : f32
    %115 = vector.broadcast %cst_46 : f32 to vector<8x128xf32>
    %116 = arith.addf %114, %115 : vector<8x128xf32>
    %117 = vector.extract_strided_slice %100 {offsets = [0, 256], sizes = [8, 128], strides = [1, 1]} : vector<8x512xf32> to vector<8x128xf32>
    %118 = math.tanh %117 : vector<8x128xf32>
    %119 = vector.extract_strided_slice %100 {offsets = [0, 384], sizes = [8, 128], strides = [1, 1]} : vector<8x512xf32> to vector<8x128xf32>
    %cst_47 = arith.constant 5.000000e-01 : f32
    %120 = vector.broadcast %cst_47 : f32 to vector<8x128xf32>
    %121 = arith.mulf %120, %119 : vector<8x128xf32>
    %122 = math.tanh %121 : vector<8x128xf32>
    %cst_48 = arith.constant 5.000000e-01 : f32
    %123 = vector.broadcast %cst_48 : f32 to vector<8x128xf32>
    %124 = arith.mulf %123, %122 : vector<8x128xf32>
    %cst_49 = arith.constant 5.000000e-01 : f32
    %125 = vector.broadcast %cst_49 : f32 to vector<8x128xf32>
    %126 = arith.addf %124, %125 : vector<8x128xf32>
    %127 = arith.mulf %116, %85 : vector<8x128xf32>
    %128 = arith.mulf %108, %118 : vector<8x128xf32>
    %129 = arith.addf %127, %128 : vector<8x128xf32>
    %130 = math.tanh %129 : vector<8x128xf32>
    %131 = arith.mulf %126, %130 : vector<8x128xf32>
    %132 = arith.truncf %131 : vector<8x128xf32> to vector<8x128xbf16>
    %133 = arith.index_cast %c2_i32 : i32 to index
    %c0_50 = arith.constant 0 : index
    %c0_51 = arith.constant 0 : index
    %134 = vector.load %arg6[%133, %c0_50, %c0_51] : memref<8x8x128xbf16, #tpu.memory_space<vmem>>, vector<1x8x128xbf16>
    %135 = vector.shape_cast %134 : vector<1x8x128xbf16> to vector<8x128xbf16>
    %136 = vector.shape_cast %132 : vector<8x128xbf16> to vector<1x8x128xbf16>
    tpu.vector_store %arg6[%133, %c0_50, %c0_51], %136 {strides = array<i32>} : memref<8x8x128xbf16, #tpu.memory_space<vmem>>, vector<1x8x128xbf16>,
    %c3_i32 = arith.constant 3 : i32
    %137 = arith.index_cast %c3_i32 : i32 to index
    %c0_52 = arith.constant 0 : index
    %c0_53 = arith.constant 0 : index
    %138 = vector.load %arg2[%137, %c0_52, %c0_53] : memref<8x8x512xbf16, #tpu.memory_space<vmem>>, vector<1x8x512xbf16>
    %139 = vector.shape_cast %138 : vector<1x8x512xbf16> to vector<8x512xbf16>
    %140 = arith.extf %139 : vector<8x512xbf16> to vector<8x512xf32>
    %141 = arith.truncf %131 : vector<8x128xf32> to vector<8x128xbf16>
    %c0_54 = arith.constant 0 : index
    %c0_55 = arith.constant 0 : index
    %142 = vector.load %arg3[%c0_54, %c0_55] : memref<128x512xbf16, #tpu.memory_space<vmem>>, vector<128x512xbf16>
    %cst_56 = arith.constant dense<0.000000e+00> : vector<8x512xf32>
    %143 = tpu.matmul %141, %142, %cst_56 {dimension_numbers = #tpu.dot_dimension_numbers<[1], [0], [0], [1], [0, 0, 1, 1], [], []>} : vector<8x128xbf16>, vector<128x512xbf16>, vector<8x512xf32> -> vector<8x512xf32>
    %144 = arith.addf %140, %143 : vector<8x512xf32>
    %145 = vector.extract_strided_slice %144 {offsets = [0, 0], sizes = [8, 128], strides = [1, 1]} : vector<8x512xf32> to vector<8x128xf32>
    %cst_57 = arith.constant 5.000000e-01 : f32
    %146 = vector.broadcast %cst_57 : f32 to vector<8x128xf32>
    %147 = arith.mulf %146, %145 : vector<8x128xf32>
    %148 = math.tanh %147 : vector<8x128xf32>
    %cst_58 = arith.constant 5.000000e-01 : f32
    %149 = vector.broadcast %cst_58 : f32 to vector<8x128xf32>
    %150 = arith.mulf %149, %148 : vector<8x128xf32>
    %cst_59 = arith.constant 5.000000e-01 : f32
    %151 = vector.broadcast %cst_59 : f32 to vector<8x128xf32>
    %152 = arith.addf %150, %151 : vector<8x128xf32>
    %153 = vector.extract_strided_slice %144 {offsets = [0, 128], sizes = [8, 128], strides = [1, 1]} : vector<8x512xf32> to vector<8x128xf32>
    %cst_60 = arith.constant 5.000000e-01 : f32
    %154 = vector.broadcast %cst_60 : f32 to vector<8x128xf32>
    %155 = arith.mulf %154, %153 : vector<8x128xf32>
    %156 = math.tanh %155 : vector<8x128xf32>
    %cst_61 = arith.constant 5.000000e-01 : f32
    %157 = vector.broadcast %cst_61 : f32 to vector<8x128xf32>
    %158 = arith.mulf %157, %156 : vector<8x128xf32>
    %cst_62 = arith.constant 5.000000e-01 : f32
    %159 = vector.broadcast %cst_62 : f32 to vector<8x128xf32>
    %160 = arith.addf %158, %159 : vector<8x128xf32>
    %161 = vector.extract_strided_slice %144 {offsets = [0, 256], sizes = [8, 128], strides = [1, 1]} : vector<8x512xf32> to vector<8x128xf32>
    %162 = math.tanh %161 : vector<8x128xf32>
    %163 = vector.extract_strided_slice %144 {offsets = [0, 384], sizes = [8, 128], strides = [1, 1]} : vector<8x512xf32> to vector<8x128xf32>
    %cst_63 = arith.constant 5.000000e-01 : f32
    %164 = vector.broadcast %cst_63 : f32 to vector<8x128xf32>
    %165 = arith.mulf %164, %163 : vector<8x128xf32>
    %166 = math.tanh %165 : vector<8x128xf32>
    %cst_64 = arith.constant 5.000000e-01 : f32
    %167 = vector.broadcast %cst_64 : f32 to vector<8x128xf32>
    %168 = arith.mulf %167, %166 : vector<8x128xf32>
    %cst_65 = arith.constant 5.000000e-01 : f32
    %169 = vector.broadcast %cst_65 : f32 to vector<8x128xf32>
    %170 = arith.addf %168, %169 : vector<8x128xf32>
    %171 = arith.mulf %160, %129 : vector<8x128xf32>
    %172 = arith.mulf %152, %162 : vector<8x128xf32>
    %173 = arith.addf %171, %172 : vector<8x128xf32>
    %174 = math.tanh %173 : vector<8x128xf32>
    %175 = arith.mulf %170, %174 : vector<8x128xf32>
    %176 = arith.truncf %175 : vector<8x128xf32> to vector<8x128xbf16>
    %177 = arith.index_cast %c3_i32 : i32 to index
    %c0_66 = arith.constant 0 : index
    %c0_67 = arith.constant 0 : index
    %178 = vector.load %arg6[%177, %c0_66, %c0_67] : memref<8x8x128xbf16, #tpu.memory_space<vmem>>, vector<1x8x128xbf16>
    %179 = vector.shape_cast %178 : vector<1x8x128xbf16> to vector<8x128xbf16>
    %180 = vector.shape_cast %176 : vector<8x128xbf16> to vector<1x8x128xbf16>
    tpu.vector_store %arg6[%177, %c0_66, %c0_67], %180 {strides = array<i32>} : memref<8x8x128xbf16, #tpu.memory_space<vmem>>, vector<1x8x128xbf16>,
    %c4_i32 = arith.constant 4 : i32
    %181 = arith.index_cast %c4_i32 : i32 to index
    %c0_68 = arith.constant 0 : index
    %c0_69 = arith.constant 0 : index
    %182 = vector.load %arg2[%181, %c0_68, %c0_69] : memref<8x8x512xbf16, #tpu.memory_space<vmem>>, vector<1x8x512xbf16>
    %183 = vector.shape_cast %182 : vector<1x8x512xbf16> to vector<8x512xbf16>
    %184 = arith.extf %183 : vector<8x512xbf16> to vector<8x512xf32>
    %185 = arith.truncf %175 : vector<8x128xf32> to vector<8x128xbf16>
    %c0_70 = arith.constant 0 : index
    %c0_71 = arith.constant 0 : index
    %186 = vector.load %arg3[%c0_70, %c0_71] : memref<128x512xbf16, #tpu.memory_space<vmem>>, vector<128x512xbf16>
    %cst_72 = arith.constant dense<0.000000e+00> : vector<8x512xf32>
    %187 = tpu.matmul %185, %186, %cst_72 {dimension_numbers = #tpu.dot_dimension_numbers<[1], [0], [0], [1], [0, 0, 1, 1], [], []>} : vector<8x128xbf16>, vector<128x512xbf16>, vector<8x512xf32> -> vector<8x512xf32>
    %188 = arith.addf %184, %187 : vector<8x512xf32>
    %189 = vector.extract_strided_slice %188 {offsets = [0, 0], sizes = [8, 128], strides = [1, 1]} : vector<8x512xf32> to vector<8x128xf32>
    %cst_73 = arith.constant 5.000000e-01 : f32
    %190 = vector.broadcast %cst_73 : f32 to vector<8x128xf32>
    %191 = arith.mulf %190, %189 : vector<8x128xf32>
    %192 = math.tanh %191 : vector<8x128xf32>
    %cst_74 = arith.constant 5.000000e-01 : f32
    %193 = vector.broadcast %cst_74 : f32 to vector<8x128xf32>
    %194 = arith.mulf %193, %192 : vector<8x128xf32>
    %cst_75 = arith.constant 5.000000e-01 : f32
    %195 = vector.broadcast %cst_75 : f32 to vector<8x128xf32>
    %196 = arith.addf %194, %195 : vector<8x128xf32>
    %197 = vector.extract_strided_slice %188 {offsets = [0, 128], sizes = [8, 128], strides = [1, 1]} : vector<8x512xf32> to vector<8x128xf32>
    %cst_76 = arith.constant 5.000000e-01 : f32
    %198 = vector.broadcast %cst_76 : f32 to vector<8x128xf32>
    %199 = arith.mulf %198, %197 : vector<8x128xf32>
    %200 = math.tanh %199 : vector<8x128xf32>
    %cst_77 = arith.constant 5.000000e-01 : f32
    %201 = vector.broadcast %cst_77 : f32 to vector<8x128xf32>
    %202 = arith.mulf %201, %200 : vector<8x128xf32>
    %cst_78 = arith.constant 5.000000e-01 : f32
    %203 = vector.broadcast %cst_78 : f32 to vector<8x128xf32>
    %204 = arith.addf %202, %203 : vector<8x128xf32>
    %205 = vector.extract_strided_slice %188 {offsets = [0, 256], sizes = [8, 128], strides = [1, 1]} : vector<8x512xf32> to vector<8x128xf32>
    %206 = math.tanh %205 : vector<8x128xf32>
    %207 = vector.extract_strided_slice %188 {offsets = [0, 384], sizes = [8, 128], strides = [1, 1]} : vector<8x512xf32> to vector<8x128xf32>
    %cst_79 = arith.constant 5.000000e-01 : f32
    %208 = vector.broadcast %cst_79 : f32 to vector<8x128xf32>
    %209 = arith.mulf %208, %207 : vector<8x128xf32>
    %210 = math.tanh %209 : vector<8x128xf32>
    %cst_80 = arith.constant 5.000000e-01 : f32
    %211 = vector.broadcast %cst_80 : f32 to vector<8x128xf32>
    %212 = arith.mulf %211, %210 : vector<8x128xf32>
    %cst_81 = arith.constant 5.000000e-01 : f32
    %213 = vector.broadcast %cst_81 : f32 to vector<8x128xf32>
    %214 = arith.addf %212, %213 : vector<8x128xf32>
    %215 = arith.mulf %204, %173 : vector<8x128xf32>
    %216 = arith.mulf %196, %206 : vector<8x128xf32>
    %217 = arith.addf %215, %216 : vector<8x128xf32>
    %218 = math.tanh %217 : vector<8x128xf32>
    %219 = arith.mulf %214, %218 : vector<8x128xf32>
    %220 = arith.truncf %219 : vector<8x128xf32> to vector<8x128xbf16>
    %221 = arith.index_cast %c4_i32 : i32 to index
    %c0_82 = arith.constant 0 : index
    %c0_83 = arith.constant 0 : index
    %222 = vector.load %arg6[%221, %c0_82, %c0_83] : memref<8x8x128xbf16, #tpu.memory_space<vmem>>, vector<1x8x128xbf16>
    %223 = vector.shape_cast %222 : vector<1x8x128xbf16> to vector<8x128xbf16>
    %224 = vector.shape_cast %220 : vector<8x128xbf16> to vector<1x8x128xbf16>
    tpu.vector_store %arg6[%221, %c0_82, %c0_83], %224 {strides = array<i32>} : memref<8x8x128xbf16, #tpu.memory_space<vmem>>, vector<1x8x128xbf16>,
    %c5_i32 = arith.constant 5 : i32
    %225 = arith.index_cast %c5_i32 : i32 to index
    %c0_84 = arith.constant 0 : index
    %c0_85 = arith.constant 0 : index
    %226 = vector.load %arg2[%225, %c0_84, %c0_85] : memref<8x8x512xbf16, #tpu.memory_space<vmem>>, vector<1x8x512xbf16>
    %227 = vector.shape_cast %226 : vector<1x8x512xbf16> to vector<8x512xbf16>
    %228 = arith.extf %227 : vector<8x512xbf16> to vector<8x512xf32>
    %229 = arith.truncf %219 : vector<8x128xf32> to vector<8x128xbf16>
    %c0_86 = arith.constant 0 : index
    %c0_87 = arith.constant 0 : index
    %230 = vector.load %arg3[%c0_86, %c0_87] : memref<128x512xbf16, #tpu.memory_space<vmem>>, vector<128x512xbf16>
    %cst_88 = arith.constant dense<0.000000e+00> : vector<8x512xf32>
    %231 = tpu.matmul %229, %230, %cst_88 {dimension_numbers = #tpu.dot_dimension_numbers<[1], [0], [0], [1], [0, 0, 1, 1], [], []>} : vector<8x128xbf16>, vector<128x512xbf16>, vector<8x512xf32> -> vector<8x512xf32>
    %232 = arith.addf %228, %231 : vector<8x512xf32>
    %233 = vector.extract_strided_slice %232 {offsets = [0, 0], sizes = [8, 128], strides = [1, 1]} : vector<8x512xf32> to vector<8x128xf32>
    %cst_89 = arith.constant 5.000000e-01 : f32
    %234 = vector.broadcast %cst_89 : f32 to vector<8x128xf32>
    %235 = arith.mulf %234, %233 : vector<8x128xf32>
    %236 = math.tanh %235 : vector<8x128xf32>
    %cst_90 = arith.constant 5.000000e-01 : f32
    %237 = vector.broadcast %cst_90 : f32 to vector<8x128xf32>
    %238 = arith.mulf %237, %236 : vector<8x128xf32>
    %cst_91 = arith.constant 5.000000e-01 : f32
    %239 = vector.broadcast %cst_91 : f32 to vector<8x128xf32>
    %240 = arith.addf %238, %239 : vector<8x128xf32>
    %241 = vector.extract_strided_slice %232 {offsets = [0, 128], sizes = [8, 128], strides = [1, 1]} : vector<8x512xf32> to vector<8x128xf32>
    %cst_92 = arith.constant 5.000000e-01 : f32
    %242 = vector.broadcast %cst_92 : f32 to vector<8x128xf32>
    %243 = arith.mulf %242, %241 : vector<8x128xf32>
    %244 = math.tanh %243 : vector<8x128xf32>
    %cst_93 = arith.constant 5.000000e-01 : f32
    %245 = vector.broadcast %cst_93 : f32 to vector<8x128xf32>
    %246 = arith.mulf %245, %244 : vector<8x128xf32>
    %cst_94 = arith.constant 5.000000e-01 : f32
    %247 = vector.broadcast %cst_94 : f32 to vector<8x128xf32>
    %248 = arith.addf %246, %247 : vector<8x128xf32>
    %249 = vector.extract_strided_slice %232 {offsets = [0, 256], sizes = [8, 128], strides = [1, 1]} : vector<8x512xf32> to vector<8x128xf32>
    %250 = math.tanh %249 : vector<8x128xf32>
    %251 = vector.extract_strided_slice %232 {offsets = [0, 384], sizes = [8, 128], strides = [1, 1]} : vector<8x512xf32> to vector<8x128xf32>
    %cst_95 = arith.constant 5.000000e-01 : f32
    %252 = vector.broadcast %cst_95 : f32 to vector<8x128xf32>
    %253 = arith.mulf %252, %251 : vector<8x128xf32>
    %254 = math.tanh %253 : vector<8x128xf32>
    %cst_96 = arith.constant 5.000000e-01 : f32
    %255 = vector.broadcast %cst_96 : f32 to vector<8x128xf32>
    %256 = arith.mulf %255, %254 : vector<8x128xf32>
    %cst_97 = arith.constant 5.000000e-01 : f32
    %257 = vector.broadcast %cst_97 : f32 to vector<8x128xf32>
    %258 = arith.addf %256, %257 : vector<8x128xf32>
    %259 = arith.mulf %248, %217 : vector<8x128xf32>
    %260 = arith.mulf %240, %250 : vector<8x128xf32>
    %261 = arith.addf %259, %260 : vector<8x128xf32>
    %262 = math.tanh %261 : vector<8x128xf32>
    %263 = arith.mulf %258, %262 : vector<8x128xf32>
    %264 = arith.truncf %263 : vector<8x128xf32> to vector<8x128xbf16>
    %265 = arith.index_cast %c5_i32 : i32 to index
    %c0_98 = arith.constant 0 : index
    %c0_99 = arith.constant 0 : index
    %266 = vector.load %arg6[%265, %c0_98, %c0_99] : memref<8x8x128xbf16, #tpu.memory_space<vmem>>, vector<1x8x128xbf16>
    %267 = vector.shape_cast %266 : vector<1x8x128xbf16> to vector<8x128xbf16>
    %268 = vector.shape_cast %264 : vector<8x128xbf16> to vector<1x8x128xbf16>
    tpu.vector_store %arg6[%265, %c0_98, %c0_99], %268 {strides = array<i32>} : memref<8x8x128xbf16, #tpu.memory_space<vmem>>, vector<1x8x128xbf16>,
    %c6_i32 = arith.constant 6 : i32
    %269 = arith.index_cast %c6_i32 : i32 to index
    %c0_100 = arith.constant 0 : index
    %c0_101 = arith.constant 0 : index
    %270 = vector.load %arg2[%269, %c0_100, %c0_101] : memref<8x8x512xbf16, #tpu.memory_space<vmem>>, vector<1x8x512xbf16>
    %271 = vector.shape_cast %270 : vector<1x8x512xbf16> to vector<8x512xbf16>
    %272 = arith.extf %271 : vector<8x512xbf16> to vector<8x512xf32>
    %273 = arith.truncf %263 : vector<8x128xf32> to vector<8x128xbf16>
    %c0_102 = arith.constant 0 : index
    %c0_103 = arith.constant 0 : index
    %274 = vector.load %arg3[%c0_102, %c0_103] : memref<128x512xbf16, #tpu.memory_space<vmem>>, vector<128x512xbf16>
    %cst_104 = arith.constant dense<0.000000e+00> : vector<8x512xf32>
    %275 = tpu.matmul %273, %274, %cst_104 {dimension_numbers = #tpu.dot_dimension_numbers<[1], [0], [0], [1], [0, 0, 1, 1], [], []>} : vector<8x128xbf16>, vector<128x512xbf16>, vector<8x512xf32> -> vector<8x512xf32>
    %276 = arith.addf %272, %275 : vector<8x512xf32>
    %277 = vector.extract_strided_slice %276 {offsets = [0, 0], sizes = [8, 128], strides = [1, 1]} : vector<8x512xf32> to vector<8x128xf32>
    %cst_105 = arith.constant 5.000000e-01 : f32
    %278 = vector.broadcast %cst_105 : f32 to vector<8x128xf32>
    %279 = arith.mulf %278, %277 : vector<8x128xf32>
    %280 = math.tanh %279 : vector<8x128xf32>
    %cst_106 = arith.constant 5.000000e-01 : f32
    %281 = vector.broadcast %cst_106 : f32 to vector<8x128xf32>
    %282 = arith.mulf %281, %280 : vector<8x128xf32>
    %cst_107 = arith.constant 5.000000e-01 : f32
    %283 = vector.broadcast %cst_107 : f32 to vector<8x128xf32>
    %284 = arith.addf %282, %283 : vector<8x128xf32>
    %285 = vector.extract_strided_slice %276 {offsets = [0, 128], sizes = [8, 128], strides = [1, 1]} : vector<8x512xf32> to vector<8x128xf32>
    %cst_108 = arith.constant 5.000000e-01 : f32
    %286 = vector.broadcast %cst_108 : f32 to vector<8x128xf32>
    %287 = arith.mulf %286, %285 : vector<8x128xf32>
    %288 = math.tanh %287 : vector<8x128xf32>
    %cst_109 = arith.constant 5.000000e-01 : f32
    %289 = vector.broadcast %cst_109 : f32 to vector<8x128xf32>
    %290 = arith.mulf %289, %288 : vector<8x128xf32>
    %cst_110 = arith.constant 5.000000e-01 : f32
    %291 = vector.broadcast %cst_110 : f32 to vector<8x128xf32>
    %292 = arith.addf %290, %291 : vector<8x128xf32>
    %293 = vector.extract_strided_slice %276 {offsets = [0, 256], sizes = [8, 128], strides = [1, 1]} : vector<8x512xf32> to vector<8x128xf32>
    %294 = math.tanh %293 : vector<8x128xf32>
    %295 = vector.extract_strided_slice %276 {offsets = [0, 384], sizes = [8, 128], strides = [1, 1]} : vector<8x512xf32> to vector<8x128xf32>
    %cst_111 = arith.constant 5.000000e-01 : f32
    %296 = vector.broadcast %cst_111 : f32 to vector<8x128xf32>
    %297 = arith.mulf %296, %295 : vector<8x128xf32>
    %298 = math.tanh %297 : vector<8x128xf32>
    %cst_112 = arith.constant 5.000000e-01 : f32
    %299 = vector.broadcast %cst_112 : f32 to vector<8x128xf32>
    %300 = arith.mulf %299, %298 : vector<8x128xf32>
    %cst_113 = arith.constant 5.000000e-01 : f32
    %301 = vector.broadcast %cst_113 : f32 to vector<8x128xf32>
    %302 = arith.addf %300, %301 : vector<8x128xf32>
    %303 = arith.mulf %292, %261 : vector<8x128xf32>
    %304 = arith.mulf %284, %294 : vector<8x128xf32>
    %305 = arith.addf %303, %304 : vector<8x128xf32>
    %306 = math.tanh %305 : vector<8x128xf32>
    %307 = arith.mulf %302, %306 : vector<8x128xf32>
    %308 = arith.truncf %307 : vector<8x128xf32> to vector<8x128xbf16>
    %309 = arith.index_cast %c6_i32 : i32 to index
    %c0_114 = arith.constant 0 : index
    %c0_115 = arith.constant 0 : index
    %310 = vector.load %arg6[%309, %c0_114, %c0_115] : memref<8x8x128xbf16, #tpu.memory_space<vmem>>, vector<1x8x128xbf16>
    %311 = vector.shape_cast %310 : vector<1x8x128xbf16> to vector<8x128xbf16>
    %312 = vector.shape_cast %308 : vector<8x128xbf16> to vector<1x8x128xbf16>
    tpu.vector_store %arg6[%309, %c0_114, %c0_115], %312 {strides = array<i32>} : memref<8x8x128xbf16, #tpu.memory_space<vmem>>, vector<1x8x128xbf16>,
    %c7_i32 = arith.constant 7 : i32
    %313 = arith.index_cast %c7_i32 : i32 to index
    %c0_116 = arith.constant 0 : index
    %c0_117 = arith.constant 0 : index
    %314 = vector.load %arg2[%313, %c0_116, %c0_117] : memref<8x8x512xbf16, #tpu.memory_space<vmem>>, vector<1x8x512xbf16>
    %315 = vector.shape_cast %314 : vector<1x8x512xbf16> to vector<8x512xbf16>
    %316 = arith.extf %315 : vector<8x512xbf16> to vector<8x512xf32>
    %317 = arith.truncf %307 : vector<8x128xf32> to vector<8x128xbf16>
    %c0_118 = arith.constant 0 : index
    %c0_119 = arith.constant 0 : index
    %318 = vector.load %arg3[%c0_118, %c0_119] : memref<128x512xbf16, #tpu.memory_space<vmem>>, vector<128x512xbf16>
    %cst_120 = arith.constant dense<0.000000e+00> : vector<8x512xf32>
    %319 = tpu.matmul %317, %318, %cst_120 {dimension_numbers = #tpu.dot_dimension_numbers<[1], [0], [0], [1], [0, 0, 1, 1], [], []>} : vector<8x128xbf16>, vector<128x512xbf16>, vector<8x512xf32> -> vector<8x512xf32>
    %320 = arith.addf %316, %319 : vector<8x512xf32>
    %321 = vector.extract_strided_slice %320 {offsets = [0, 0], sizes = [8, 128], strides = [1, 1]} : vector<8x512xf32> to vector<8x128xf32>
    %cst_121 = arith.constant 5.000000e-01 : f32
    %322 = vector.broadcast %cst_121 : f32 to vector<8x128xf32>
    %323 = arith.mulf %322, %321 : vector<8x128xf32>
    %324 = math.tanh %323 : vector<8x128xf32>
    %cst_122 = arith.constant 5.000000e-01 : f32
    %325 = vector.broadcast %cst_122 : f32 to vector<8x128xf32>
    %326 = arith.mulf %325, %324 : vector<8x128xf32>
    %cst_123 = arith.constant 5.000000e-01 : f32
    %327 = vector.broadcast %cst_123 : f32 to vector<8x128xf32>
    %328 = arith.addf %326, %327 : vector<8x128xf32>
    %329 = vector.extract_strided_slice %320 {offsets = [0, 128], sizes = [8, 128], strides = [1, 1]} : vector<8x512xf32> to vector<8x128xf32>
    %cst_124 = arith.constant 5.000000e-01 : f32
    %330 = vector.broadcast %cst_124 : f32 to vector<8x128xf32>
    %331 = arith.mulf %330, %329 : vector<8x128xf32>
    %332 = math.tanh %331 : vector<8x128xf32>
    %cst_125 = arith.constant 5.000000e-01 : f32
    %333 = vector.broadcast %cst_125 : f32 to vector<8x128xf32>
    %334 = arith.mulf %333, %332 : vector<8x128xf32>
    %cst_126 = arith.constant 5.000000e-01 : f32
    %335 = vector.broadcast %cst_126 : f32 to vector<8x128xf32>
    %336 = arith.addf %334, %335 : vector<8x128xf32>
    %337 = vector.extract_strided_slice %320 {offsets = [0, 256], sizes = [8, 128], strides = [1, 1]} : vector<8x512xf32> to vector<8x128xf32>
    %338 = math.tanh %337 : vector<8x128xf32>
    %339 = vector.extract_strided_slice %320 {offsets = [0, 384], sizes = [8, 128], strides = [1, 1]} : vector<8x512xf32> to vector<8x128xf32>
    %cst_127 = arith.constant 5.000000e-01 : f32
    %340 = vector.broadcast %cst_127 : f32 to vector<8x128xf32>
    %341 = arith.mulf %340, %339 : vector<8x128xf32>
    %342 = math.tanh %341 : vector<8x128xf32>
    %cst_128 = arith.constant 5.000000e-01 : f32
    %343 = vector.broadcast %cst_128 : f32 to vector<8x128xf32>
    %344 = arith.mulf %343, %342 : vector<8x128xf32>
    %cst_129 = arith.constant 5.000000e-01 : f32
    %345 = vector.broadcast %cst_129 : f32 to vector<8x128xf32>
    %346 = arith.addf %344, %345 : vector<8x128xf32>
    %347 = arith.mulf %336, %305 : vector<8x128xf32>
    %348 = arith.mulf %328, %338 : vector<8x128xf32>
    %349 = arith.addf %347, %348 : vector<8x128xf32>
    %350 = math.tanh %349 : vector<8x128xf32>
    %351 = arith.mulf %346, %350 : vector<8x128xf32>
    %352 = arith.truncf %351 : vector<8x128xf32> to vector<8x128xbf16>
    %353 = arith.index_cast %c7_i32 : i32 to index
    %c0_130 = arith.constant 0 : index
    %c0_131 = arith.constant 0 : index
    %354 = vector.load %arg6[%353, %c0_130, %c0_131] : memref<8x8x128xbf16, #tpu.memory_space<vmem>>, vector<1x8x128xbf16>
    %355 = vector.shape_cast %354 : vector<1x8x128xbf16> to vector<8x128xbf16>
    %356 = vector.shape_cast %352 : vector<8x128xbf16> to vector<1x8x128xbf16>
    tpu.vector_store %arg6[%353, %c0_130, %c0_131], %356 {strides = array<i32>} : memref<8x8x128xbf16, #tpu.memory_space<vmem>>, vector<1x8x128xbf16>,
    %c8_i32 = arith.constant 8 : i32
    %c0_132 = arith.constant 0 : index
    %c0_133 = arith.constant 0 : index
    %357 = vector.load %arg9[%c0_132, %c0_133] : memref<8x128xf32, #tpu.memory_space<vmem>>, vector<8x128xf32>
    tpu.vector_store %arg9[%c0_132, %c0_133], %351 {strides = array<i32>} : memref<8x128xf32, #tpu.memory_space<vmem>>, vector<8x128xf32>,
    %c0_134 = arith.constant 0 : index
    %c0_135 = arith.constant 0 : index
    %358 = vector.load %arg10[%c0_134, %c0_135] : memref<8x128xf32, #tpu.memory_space<vmem>>, vector<8x128xf32>
    tpu.vector_store %arg10[%c0_134, %c0_135], %349 {strides = array<i32>} : memref<8x128xf32, #tpu.memory_space<vmem>>, vector<8x128xf32>,
    %c0_i32_136 = arith.constant 0 : i32
    %359 = arith.cmpi eq, %arg1, %c0_i32_136 : i32
    %360 = arith.extui %359 : i1 to i32
    %c0_i32_137 = arith.constant 0 : i32
    %361 = arith.cmpi ne, %360, %c0_i32_137 : i32
    scf.if %361 {
      %c0_138 = arith.constant 0 : index
      %c0_139 = arith.constant 0 : index
      %362 = vector.load %arg7[%c0_138, %c0_139] : memref<8x128xf32, #tpu.memory_space<vmem>>, vector<8x128xf32>
      tpu.vector_store %arg7[%c0_138, %c0_139], %351 {strides = array<i32>} : memref<8x128xf32, #tpu.memory_space<vmem>>, vector<8x128xf32>,
      %c0_140 = arith.constant 0 : index
      %c0_141 = arith.constant 0 : index
      %363 = vector.load %arg8[%c0_140, %c0_141] : memref<8x128xf32, #tpu.memory_space<vmem>>, vector<8x128xf32>
      tpu.vector_store %arg8[%c0_140, %c0_141], %349 {strides = array<i32>} : memref<8x128xf32, #tpu.memory_space<vmem>>, vector<8x128xf32>,
    } else {
    }
    return
  }
  func.func @transform_0(%arg0: i32, %arg1: i32) -> (i32, i32, i32) {
    %c0_i32 = arith.constant 0 : i32
    %c0_i32_0 = arith.constant 0 : i32
    return %arg1, %arg0, %c0_i32 : i32, i32, i32
  }
  func.func @transform_1(%arg0: i32, %arg1: i32) -> (i32, i32) {
    %c0_i32 = arith.constant 0 : i32
    %c0_i32_0 = arith.constant 0 : i32
    %c0_i32_1 = arith.constant 0 : i32
    return %c0_i32, %c0_i32_0 : i32, i32
  }
  func.func @transform_2(%arg0: i32, %arg1: i32) -> (i32, i32) {
    %c0_i32 = arith.constant 0 : i32
    %c0_i32_0 = arith.constant 0 : i32
    return %arg0, %c0_i32 : i32, i32
  }
  func.func @transform_3(%arg0: i32, %arg1: i32) -> (i32, i32) {
    %c0_i32 = arith.constant 0 : i32
    %c0_i32_0 = arith.constant 0 : i32
    return %arg0, %c0_i32 : i32, i32
  }
  func.func @transform_4(%arg0: i32, %arg1: i32) -> (i32, i32, i32) {
    %c0_i32 = arith.constant 0 : i32
    %c0_i32_0 = arith.constant 0 : i32
    return %arg1, %arg0, %c0_i32 : i32, i32, i32
  }
  func.func @transform_5(%arg0: i32, %arg1: i32) -> (i32, i32) {
    %c0_i32 = arith.constant 0 : i32
    %c0_i32_0 = arith.constant 0 : i32
    return %arg0, %c0_i32 : i32, i32
  }
  func.func @transform_6(%arg0: i32, %arg1: i32) -> (i32, i32) {
    %c0_i32 = arith.constant 0 : i32
    %c0_i32_0 = arith.constant 0 : i32
    return %arg0, %c0_i32 : i32, i32
  }
}

</mosaic_0001>

<bundles_post_ra>
// kernel: tpu_custom_call.1
= control target key start
LH: loop header
LB: loop body
LE: loop exit
PB: predicated region body
PF: predicated region fallthrough
CT: control target
= control target key end

     0   :  { %12 = vsyncpa [#allocation5], 0  ;;  %s3720_s0 = inlined_call_operand.hbm [shape: bf16[8,8,512], index: 0, kind: input, shape index: {}]   ;;  %s3721_s1 = inlined_call_operand.hbm [shape: bf16[128,512], index: 1, kind: input, shape index: {}]   ;;  %s3722_s2 = inlined_call_operand.hbm [shape: f32[8,128], index: 2, kind: input, shape index: {}]   ;;  %s3723_s3 = inlined_call_operand.vmem [shape: f32[8,128], index: 3, kind: input, shape index: {}]   ;;  %s3724_s4 = inlined_call_operand.hbm [shape: bf16[8,8,128], index: 4, kind: output, shape index: {0}]   ;;  %s3725_s5 = inlined_call_operand.hbm [shape: f32[8,128], index: 5, kind: output, shape index: {1}]   ;;  %s3726_s6 = inlined_call_operand.hbm [shape: f32[8,128], index: 6, kind: output, shape index: {2}]  }
   0x1   :  { %13 = vsyncpa [#allocation8], 0 }
   0x2   :  { %14 = vsyncpa [#allocation6], 0 }
   0x3   :  { %15 = vsyncpa [#allocation12], 0  ;;  %s3154_s21 = smov [#allocation7]   ;;  %s3155_s23 = smov [#allocation4]  }
   0x4   :  { %s33_s22 = sshll.u32 %s3154_s21, 4  ;;  %s21_s24 = sshll.u32 %s3155_s23, 4  ;;  %s34_s22 = int_to_ptr.vmem [resolvable:$true] %s33_s22  ;;  %s3200_s24 = int_to_ptr.vmem [resolvable:$true] %s21_s24 }
   0x5   :  { %s3014_s27 = scalar_lea.hbm %s3721_s1, 4096 }
   0x6   :  { %p3015_p0 = scmp.ne.s32.totalorder %s3721_s1, %s3014_s27  ;;  %p3018_p1 = scmp.lt.u32.totalorder %s3014_s27, %s3721_s1 }
   0x8   :  { %p3020_p2 = pnand %p3018_p1, %p3015_p0 }
   0xa   :  { %3023 = shalt.err (!%p3020_p2)
}
   0xb   :  { %s3024_s8 = scalar_lea.vmem %s34_s22, 4096  ;;  %p3029_p4 = scmp.lt.s32.totalorder %s34_s22, %s34_s22 }
   0xc   :  { %p3025_p3 = scmp.ne.s32.totalorder %s34_s22, %s3024_s8  ;;  %p3030_p5 = scmp.lt.s32.totalorder %s3024_s8, %s3024_s8 }
   0xe   :  { %p3031_p6 = por %p3030_p5, %p3029_p4 }
  0x10   :  { %p3032_p7 = pnand %p3031_p6, %p3025_p3 }
  0x12   :  { %3035 = shalt.err (!%p3032_p7)
}
  0x13   :  { %s3156_s9 = smov 256   ;;  %s3157_s10 = smov 16  }
  0x14   :  { %39 = dma.hbm_to_vmem [thread:$0]  %s3721_s1, 4096, %s34_s22, [#allocation8], %s3156_s9, %s3156_s9, %s3157_s10  }
  0x15   :  { %s3036_s15 = scalar_lea.hbm %s3720_s0, 2048 }
  0x16   :  { %p3037_p8 = scmp.ne.s32.totalorder %s3720_s0, %s3036_s15  ;;  %p3040_p9 = scmp.lt.u32.totalorder %s3036_s15, %s3720_s0 }
  0x18   :  { %p3042_p10 = pnand %p3040_p9, %p3037_p8 }
  0x1a   :  { %3045 = shalt.err (!%p3042_p10)
}
  0x1b   :  { %s3046_s20 = scalar_lea.vmem %s3200_s24, 2048  ;;  %p3051_p12 = scmp.lt.s32.totalorder %s3200_s24, %s3200_s24 }
  0x1c   :  { %p3047_p11 = scmp.ne.s32.totalorder %s3200_s24, %s3046_s20  ;;  %p3052_p13 = scmp.lt.s32.totalorder %s3046_s20, %s3046_s20 }
  0x1e   :  { %p3053_p0 = por %p3052_p13, %p3051_p12 }
  0x20   :  { %p3054_p1 = pnand %p3053_p0, %p3047_p11 }
  0x22   :  { %3057 = shalt.err (!%p3054_p1)
}
  0x23   :  { %27 = dma.hbm_to_vmem [thread:$0]  %s3720_s0, 2048, %s3200_s24, [#allocation5], %s3156_s9, %s3156_s9, %s3157_s10  }
  0x24   :  { %s3158_s22 = smov [#allocation9]   ;;  %s3058_s27 = scalar_lea.hbm %s3722_s2, 128 }
  0x25   :  { %s46_s23 = sshll.u32 %s3158_s22, 4  ;;  %p3059_p2 = scmp.ne.s32.totalorder %s3722_s2, %s3058_s27  ;;  %s47_s23 = int_to_ptr.vmem [resolvable:$true] %s46_s23 }
  0x26   :  { %p3062_p3 = scmp.lt.u32.totalorder %s3058_s27, %s3722_s2 }
  0x28   :  { %p3064_p4 = pnand %p3062_p3, %p3059_p2 }
  0x2a   :  { %3067 = shalt.err (!%p3064_p4)
}
  0x2b   :  { %s3068_s8 = scalar_lea.vmem %s47_s23, 128  ;;  %p3073_p6 = scmp.lt.s32.totalorder %s47_s23, %s47_s23 }
  0x2c   :  { %p3069_p5 = scmp.ne.s32.totalorder %s47_s23, %s3068_s8  ;;  %p3074_p7 = scmp.lt.s32.totalorder %s3068_s8, %s3068_s8 }
  0x2e   :  { %p3075_p8 = por %p3074_p7, %p3073_p6 }
  0x30   :  { %p3076_p9 = pnand %p3075_p8, %p3069_p5 }
  0x32   :  { %3079 = shalt.err (!%p3076_p9)
}
  0x33   :  { %49 = dma.hbm_to_vmem [thread:$0]  %s3722_s2, 128, %s47_s23, [#allocation8]  }
  0x34   :  { %3146 = dma.done.wait [#allocation5], 2048  }
  0x35   :  { %3147 = vsyncadd [#allocation5], 4294965248 }
  0x36   :  { %3148 = dma.done.wait [#allocation8], 4224  }
  0x37   :  { %3149 = vsyncadd [#allocation8], 4294963072  ;;  %v3159_v0 = vmov 0   ;;  %v3245_v1 = vld [vmem:[#allocation7 + $0x4] ss:$16 sps:$4 sm:$0xff]   ;;  %v73_v37 = vld [vmem:[#allocation4 + $0x8] sm:$0xff] }
  0x38   :  { %303 = vmatprep.mubr.bf16.mxu0 %v3159_v0  ;;  %344 = vmatprep.mubr.bf16.mxu1 %v3159_v0  ;;  %v3247_v2 = vld [vmem:[#allocation7] ss:$16 sps:$4 sm:$0xff]   ;;  %v3250_v3 = vld [vmem:[#allocation7 + $0x24] ss:$16 sps:$4 sm:$0xff]   ;;  %v3253_v4 = vld [vmem:[#allocation7 + $0xc] ss:$16 sps:$4 sm:$0xff]   ;;  %v76_v40 = vunpack.c.l.bf16 %v73_v37  ;;  %v77_v51 = vunpack.c.h.bf16 %v73_v37 }
  0x39   :  { %271 = vmatprep.subr.bf16.mxu0 %v3245_v1  ;;  %v3255_v5 = vld [vmem:[#allocation7 + $0x20] ss:$16 sps:$4 sm:$0xff]   ;;  %v3257_v6 = vld [vmem:[#allocation7 + $0x8] ss:$16 sps:$4 sm:$0xff]   ;;  %v3260_v7 = vld [vmem:[#allocation7 + $0x44] ss:$16 sps:$4 sm:$0xff]   ;;  %312 = vmatprep.subr.bf16.mxu1 %v3253_v4 }
  0x3a   :  { %272 = vmatpush1.bf16.msra.mxu0 %v3247_v2  ;;  %v3263_v8 = vld [vmem:[#allocation7 + $0x2c] ss:$16 sps:$4 sm:$0xff]   ;;  %313 = vmatpush1.bf16.msra.mxu1 %v3257_v6  ;;  %v3266_v9 = vld [vmem:[#allocation7 + $0x28] ss:$16 sps:$4 sm:$0xff]   ;;  %v3270_v10 = vld [vmem:[#allocation7 + $0x40] ss:$16 sps:$4 sm:$0xff]  }
  0x3b   :  { %273 = vmatprep.subr.bf16.mxu0 %v3250_v3  ;;  %314 = vmatprep.subr.bf16.mxu1 %v3263_v8  ;;  %v3273_v11 = vld [vmem:[#allocation7 + $0x64] ss:$16 sps:$4 sm:$0xff]   ;;  %v3275_v12 = vld [vmem:[#allocation7 + $0x4c] ss:$16 sps:$4 sm:$0xff]   ;;  %v3278_v13 = vld [vmem:[#allocation7 + $0x48] ss:$16 sps:$4 sm:$0xff]  }
  0x3c   :  { %v3282_v14 = vld [vmem:[#allocation7 + $0x60] ss:$16 sps:$4 sm:$0xff]   ;;  %v3284_v15 = vld [vmem:[#allocation7 + $0x6c] ss:$16 sps:$4 sm:$0xff]   ;;  %v3287_v16 = vld [vmem:[#allocation7 + $0x84] ss:$16 sps:$4 sm:$0xff]  }
  0x3d   :  { %v3290_v17 = vld [vmem:[#allocation7 + $0x80] ss:$16 sps:$4 sm:$0xff]   ;;  %v3292_v18 = vld [vmem:[#allocation7 + $0x68] ss:$16 sps:$4 sm:$0xff]   ;;  %v3296_v19 = vld [vmem:[#allocation7 + $0x8c] ss:$16 sps:$4 sm:$0xff]  }
  0x3e   :  { %274 = vmatpush1.bf16.msra.mxu0 %v3255_v5  ;;  %315 = vmatpush1.bf16.msra.mxu1 %v3266_v9  ;;  %v3299_v20 = vld [vmem:[#allocation7 + $0xa4] ss:$16 sps:$4 sm:$0xff]   ;;  %v3302_v21 = vld [vmem:[#allocation7 + $0x88] ss:$16 sps:$4 sm:$0xff]   ;;  %v3306_v22 = vld [vmem:[#allocation7 + $0xa0] ss:$16 sps:$4 sm:$0xff]  }
  0x3f   :  { %275 = vmatprep.subr.bf16.mxu0 %v3260_v7  ;;  %316 = vmatprep.subr.bf16.mxu1 %v3275_v12  ;;  %v3308_v23 = vld [vmem:[#allocation7 + $0xac] ss:$16 sps:$4 sm:$0xff]   ;;  %v3311_v24 = vld [vmem:[#allocation7 + $0xc4] ss:$16 sps:$4 sm:$0xff]   ;;  %v3313_v25 = vld [vmem:[#allocation7 + $0xc0] ss:$16 sps:$4 sm:$0xff]  }
  0x40   :  { %v3315_v26 = vld [vmem:[#allocation7 + $0xa8] ss:$16 sps:$4 sm:$0xff]   ;;  %v3317_v27 = vld [vmem:[#allocation7 + $0xcc] ss:$16 sps:$4 sm:$0xff]   ;;  %v3320_v28 = vld [vmem:[#allocation7 + $0xe4] ss:$16 sps:$4 sm:$0xff]  }
  0x41   :  { %v3325_v29 = vld [vmem:[#allocation7 + $0xc8] ss:$16 sps:$4 sm:$0xff]   ;;  %v3327_v30 = vld [vmem:[#allocation7 + $0xe0] ss:$16 sps:$4 sm:$0xff]   ;;  %v3329_v32 = vld [vmem:[#allocation7 + $0xec] ss:$16 sps:$4 sm:$0xff]  }
  0x42   :  { %276 = vmatpush1.bf16.msra.mxu0 %v3270_v10  ;;  %317 = vmatpush1.bf16.msra.mxu1 %v3278_v13  ;;  %v66_v31 = vld [vmem:[#allocation9] sm:$0xff]  ;;  %v3335_v33 = vld [vmem:[#allocation7 + $0xe8] ss:$16 sps:$4 sm:$0xff]   ;;  %s3161_s11 = smov [#allocation10]   ;;  %s3162_s13 = smov [#allocation13]  }
  0x43   :  { %277 = vmatprep.subr.bf16.mxu0 %v3273_v11  ;;  %318 = vmatprep.subr.bf16.mxu1 %v3284_v15  ;;  %v78_v34 = vpack.c.bf16 %v66_v31, %v66_v31  ;;  %v72_v35 = vld [vmem:[#allocation4] sm:$0xff]  ;;  %s2531_s12 = sshll.u32 %s3161_s11, 4  ;;  %s2554_s14 = sshll.u32 %s3162_s13, 4  ;;  %s3670_s12 = int_to_ptr.vmem [resolvable:$true] %s2531_s12  ;;  %s3672_s14 = int_to_ptr.vmem [resolvable:$true] %s2554_s14 }
  0x44   :  { %v74_v36 = vunpack.c.l.bf16 %v72_v35  ;;  %v75_v38 = vunpack.c.h.bf16 %v72_v35  ;;  %v68_v62 = vld [vmem:[%s3723_s3] sm:$0xff]  ;;  %s3160_s3 = smov [#allocation11]  }
  0x45   :  { %s2544_s10 = sshll.u32 %s3160_s3, 4  ;;  %s2545_s10 = int_to_ptr.vmem [resolvable:$true] %s2544_s10 }
  0x46   :  { %278 = vmatpush1.bf16.msra.mxu0 %v3282_v14  ;;  %319 = vmatpush1.bf16.msra.mxu1 %v3292_v18  ;;  %s3080_s15 = scalar_lea.vmem %s2545_s10, 128  ;;  %p3085_p11 = scmp.lt.s32.totalorder %s2545_s10, %s2545_s10 }
  0x47   :  { %279 = vmatprep.subr.bf16.mxu0 %v3287_v16  ;;  %320 = vmatprep.subr.bf16.mxu1 %v3296_v19  ;;  %p3081_p10 = scmp.ne.s32.totalorder %s2545_s10, %s3080_s15  ;;  %p3086_p12 = scmp.lt.s32.totalorder %s3080_s15, %s3080_s15 }
  0x49   :  { %p3087_p13 = por %p3086_p12, %p3085_p11 }
  0x4a   :  { %280 = vmatpush1.bf16.msra.mxu0 %v3290_v17  ;;  %321 = vmatpush1.bf16.msra.mxu1 %v3302_v21 }
  0x4b   :  { %281 = vmatprep.subr.bf16.mxu0 %v3299_v20  ;;  %322 = vmatprep.subr.bf16.mxu1 %v3308_v23  ;;  %p3088_p0 = pnand %p3087_p13, %p3081_p10 }
  0x4e   :  { %282 = vmatpush1.bf16.msra.mxu0 %v3306_v22  ;;  %323 = vmatpush1.bf16.msra.mxu1 %v3315_v26 }
  0x4f   :  { %283 = vmatprep.subr.bf16.mxu0 %v3311_v24  ;;  %324 = vmatprep.subr.bf16.mxu1 %v3317_v27 }
  0x52   :  { %284 = vmatpush1.bf16.msra.mxu0 %v3313_v25  ;;  %325 = vmatpush1.bf16.msra.mxu1 %v3325_v29 }
  0x53   :  { %285 = vmatprep.subr.bf16.mxu0 %v3320_v28  ;;  %326 = vmatprep.subr.bf16.mxu1 %v3329_v32 }
  0x56   :  { %286 = vmatpush1.bf16.msra.mxu0 %v3327_v30  ;;  %327 = vmatpush1.bf16.msra.mxu1 %v3335_v33 }
  0x57   :  { %576 = vmatprep.subr.bf16.mxu0 %v3245_v1  ;;  %617 = vmatprep.subr.bf16.mxu1 %v3253_v4 }
  0x59   :  { %304 = vmatmul.mubr.bf16.vlgmr.msra.gmra.mrb[0].mxu0 %v78_v34  ;;  %345 = vmatmul.mubr.bf16.vlgmr.msra.gmra.mrb[0].mxu1 %v78_v34 }
  0x5a   :  { %577 = vmatpush1.bf16.msra.mxu0 %v3247_v2  ;;  %608 = vmatprep.mubr.bf16.mxu0 %v3159_v0 }
  0x5b   :  { %578 = vmatprep.subr.bf16.mxu0 %v3250_v3  ;;  %618 = vmatpush1.bf16.msra.mxu1 %v3257_v6 }
  0x5c   :  { %649 = vmatprep.mubr.bf16.mxu1 %v3159_v0  ;;  %619 = vmatprep.subr.bf16.mxu1 %v3263_v8 }
  0x5e   :  { %579 = vmatpush1.bf16.msra.mxu0 %v3255_v5 }
  0x5f   :  { %580 = vmatprep.subr.bf16.mxu0 %v3260_v7  ;;  %620 = vmatpush1.bf16.msra.mxu1 %v3266_v9 }
  0x60   :  { %621 = vmatprep.subr.bf16.mxu1 %v3275_v12 }
  0x62   :  { %581 = vmatpush1.bf16.msra.mxu0 %v3270_v10 }
  0x63   :  { %582 = vmatprep.subr.bf16.mxu0 %v3273_v11  ;;  %622 = vmatpush1.bf16.msra.mxu1 %v3278_v13 }
  0x64   :  { %623 = vmatprep.subr.bf16.mxu1 %v3284_v15 }
  0x66   :  { %583 = vmatpush1.bf16.msra.mxu0 %v3282_v14 }
  0x67   :  { %584 = vmatprep.subr.bf16.mxu0 %v3287_v16  ;;  %624 = vmatpush1.bf16.msra.mxu1 %v3292_v18 }
  0x68   :  { %625 = vmatprep.subr.bf16.mxu1 %v3296_v19 }
  0x6a   :  { %585 = vmatpush1.bf16.msra.mxu0 %v3290_v17 }
  0x6b   :  { %586 = vmatprep.subr.bf16.mxu0 %v3299_v20  ;;  %626 = vmatpush1.bf16.msra.mxu1 %v3302_v21 }
  0x6c   :  { %627 = vmatprep.subr.bf16.mxu1 %v3308_v23 }
  0x6e   :  { %587 = vmatpush1.bf16.msra.mxu0 %v3306_v22 }
  0x6f   :  { %588 = vmatprep.subr.bf16.mxu0 %v3311_v24  ;;  %628 = vmatpush1.bf16.msra.mxu1 %v3315_v26 }
  0x70   :  { %629 = vmatprep.subr.bf16.mxu1 %v3317_v27 }
  0x72   :  { %589 = vmatpush1.bf16.msra.mxu0 %v3313_v25 }
  0x73   :  { %590 = vmatprep.subr.bf16.mxu0 %v3320_v28  ;;  %630 = vmatpush1.bf16.msra.mxu1 %v3325_v29 }
  0x74   :  { %631 = vmatprep.subr.bf16.mxu1 %v3329_v32 }
  0x76   :  { %591 = vmatpush1.bf16.msra.mxu0 %v3327_v30 }
  0x77   :  { %882 = vmatprep.subr.bf16.mxu0 %v3245_v1  ;;  %632 = vmatpush1.bf16.msra.mxu1 %v3335_v33 }
  0x78   :  { %923 = vmatprep.subr.bf16.mxu1 %v3253_v4 }
 0x12c   :  { %v305_v39 = vpop.f32.mrb[0].mxu0  ;;  %v346_v47 = vpop.f32.mrb[0].mxu1 }
 0x12d   :  { %v353_v41 = vadd.f32 %v305_v39, %v74_v36  ;;  %v307_v42 = vpop.f32.mrb[1].mxu0  ;;  %v355_v49 = vadd.f32 %v346_v47, %v76_v40  ;;  %v348_v50 = vpop.f32.mrb[1].mxu1 }
 0x12e   :  { %v354_v43 = vadd.f32 %v307_v42, %v75_v38  ;;  %v309_v44 = vpop.f32.mrb[2].mxu0  ;;  %v350_v52 = vpop.f32.mrb[2].mxu1  ;;  %v356_v54 = vadd.f32 %v348_v50, %v77_v51  ;;  %v378_v42 = vld [vmem:[#allocation4 + $0x10] sm:$0xff] }
 0x12f   :  { %v357_v45 = vmul.f32 0.5, %v353_v41  ;;  %v310_v46 = vpop.f32.mrb[3].mxu0  ;;  %v351_v53 = vpop.f32.mrb[3].mxu1  ;;  %v379_v44 = vld [vmem:[#allocation4 + $0x18] sm:$0xff] }
 0x130   :  { %v361_v48 = vmul.f32 0.5, %v354_v43  ;;  %v366_v55 = vmul.f32 0.5, %v356_v54  ;;  %v380_v43 = vunpack.c.l.bf16 %v378_v42 }
 0x131   :  { %2934 = vtanh.f32 %v357_v45  ;;  %v381_v45 = vunpack.c.h.bf16 %v378_v42 }
 0x132   :  { %2936 = vtanh.f32 %v361_v48 }
 0x133   :  { %2938 = vtanh.f32 %v355_v49  ;;  %v382_v49 = vunpack.c.l.bf16 %v379_v44 }
 0x134   :  { %2940 = vtanh.f32 %v366_v55 }
 0x13b   :  { %v2935_v56 = vpop.eup %2934 }
 0x13c   :  { %v2937_v57 = vpop.eup %2936  ;;  %v359_v58 = vmul.f32 0.5, %v2935_v56 }
 0x13d   :  { %v2939_v59 = vpop.eup %2938  ;;  %v363_v60 = vmul.f32 0.5, %v2937_v57 }
 0x13e   :  { %v360_v61 = vadd.f32 0.5, %v359_v58  ;;  %v2941_v36 = vpop.eup %2940 }
 0x13f   :  { %v364_v63 = vadd.f32 0.5, %v363_v60  ;;  %v368_v37 = vmul.f32 0.5, %v2941_v36 }
 0x140   :  { %v371_v31 = vmul.f32 %v2939_v59, %v360_v61 }
 0x141   :  { %v370_v34 = vmul.f32 %v364_v63, %v68_v62  ;;  %v369_v38 = vadd.f32 0.5, %v368_v37 }
 0x143   :  { %v3380_v35 = vadd.f32 %v371_v31, %v370_v34 }
 0x145   :  { %2942 = vtanh.f32 %v3380_v35 }
 0x14f   :  { %v2943_v39 = vpop.eup %2942 }
 0x150   :  { %v374_v40 = vmul.f32 %v2943_v39, %v369_v38 }
 0x152   :  { %v375_v41 = vpack.c.bf16 %v374_v40, %v374_v40 }
 0x154   :  { %376 = vst [vmem:[#allocation10] sm:$0xf] %v375_v41  ;;  %609 = vmatmul.mubr.bf16.vlgmr.msra.gmra.mrb[4].mxu0 %v375_v41  ;;  %650 = vmatmul.mubr.bf16.vlgmr.msra.gmra.mrb[4].mxu1 %v375_v41 }
 0x155   :  { %883 = vmatpush1.bf16.msra.mxu0 %v3247_v2  ;;  %924 = vmatpush1.bf16.msra.mxu1 %v3257_v6 }
 0x156   :  { %884 = vmatprep.subr.bf16.mxu0 %v3250_v3  ;;  %925 = vmatprep.subr.bf16.mxu1 %v3263_v8 }
 0x157   :  { %914 = vmatprep.mubr.bf16.mxu0 %v3159_v0  ;;  %955 = vmatprep.mubr.bf16.mxu1 %v3159_v0 }
 0x159   :  { %885 = vmatpush1.bf16.msra.mxu0 %v3255_v5  ;;  %926 = vmatpush1.bf16.msra.mxu1 %v3266_v9 }
 0x15a   :  { %886 = vmatprep.subr.bf16.mxu0 %v3260_v7  ;;  %927 = vmatprep.subr.bf16.mxu1 %v3275_v12 }
 0x15d   :  { %887 = vmatpush1.bf16.msra.mxu0 %v3270_v10  ;;  %928 = vmatpush1.bf16.msra.mxu1 %v3278_v13 }
 0x15e   :  { %888 = vmatprep.subr.bf16.mxu0 %v3273_v11  ;;  %929 = vmatprep.subr.bf16.mxu1 %v3284_v15 }
 0x161   :  { %889 = vmatpush1.bf16.msra.mxu0 %v3282_v14  ;;  %930 = vmatpush1.bf16.msra.mxu1 %v3292_v18 }
 0x162   :  { %890 = vmatprep.subr.bf16.mxu0 %v3287_v16  ;;  %931 = vmatprep.subr.bf16.mxu1 %v3296_v19 }
 0x165   :  { %891 = vmatpush1.bf16.msra.mxu0 %v3290_v17  ;;  %932 = vmatpush1.bf16.msra.mxu1 %v3302_v21 }
 0x166   :  { %892 = vmatprep.subr.bf16.mxu0 %v3299_v20  ;;  %933 = vmatprep.subr.bf16.mxu1 %v3308_v23 }
 0x169   :  { %893 = vmatpush1.bf16.msra.mxu0 %v3306_v22  ;;  %934 = vmatpush1.bf16.msra.mxu1 %v3315_v26 }
 0x16a   :  { %894 = vmatprep.subr.bf16.mxu0 %v3311_v24  ;;  %935 = vmatprep.subr.bf16.mxu1 %v3317_v27 }
 0x16d   :  { %895 = vmatpush1.bf16.msra.mxu0 %v3313_v25  ;;  %936 = vmatpush1.bf16.msra.mxu1 %v3325_v29 }
 0x16e   :  { %896 = vmatprep.subr.bf16.mxu0 %v3320_v28  ;;  %937 = vmatprep.subr.bf16.mxu1 %v3329_v32 }
 0x171   :  { %897 = vmatpush1.bf16.msra.mxu0 %v3327_v30  ;;  %938 = vmatpush1.bf16.msra.mxu1 %v3335_v33 }
 0x172   :  { %1188 = vmatprep.subr.bf16.mxu0 %v3245_v1  ;;  %1229 = vmatprep.subr.bf16.mxu1 %v3253_v4  ;;  %v383_v4 = vunpack.c.h.bf16 %v379_v44 }
 0x227   :  { %v610_v46 = vpop.f32.mrb[4].mxu0  ;;  %v651_v47 = vpop.f32.mrb[4].mxu1 }
 0x228   :  { %v658_v48 = vadd.f32 %v610_v46, %v380_v43  ;;  %v612_v50 = vpop.f32.mrb[5].mxu0  ;;  %v653_v51 = vpop.f32.mrb[5].mxu1  ;;  %v660_v1 = vadd.f32 %v651_v47, %v382_v49 }
 0x229   :  { %v659_v52 = vadd.f32 %v612_v50, %v381_v45  ;;  %v614_v53 = vpop.f32.mrb[6].mxu0  ;;  %v655_v54 = vpop.f32.mrb[6].mxu1  ;;  %v661_v59 = vadd.f32 %v653_v51, %v383_v4  ;;  %v3477_v4 = vld [vmem:[#allocation7 + $0x28] ss:$16 sps:$4 sm:$0xff]  }
 0x22a   :  { %v662_v55 = vmul.f32 0.5, %v658_v48  ;;  %v615_v56 = vpop.f32.mrb[7].mxu0  ;;  %v656_v57 = vpop.f32.mrb[7].mxu1  ;;  %v3459_v53 = vld [vmem:[#allocation7 + $0x4] ss:$16 sps:$4 sm:$0xff]  }
 0x22b   :  { %v666_v58 = vmul.f32 0.5, %v659_v52  ;;  %v671_v60 = vmul.f32 0.5, %v661_v59  ;;  %v3461_v54 = vld [vmem:[#allocation7 + $0xc] ss:$16 sps:$4 sm:$0xff]   ;;  %v3465_v56 = vld [vmem:[#allocation7 + $0x8] ss:$16 sps:$4 sm:$0xff]  }
 0x22c   :  { %2944 = vtanh.f32 %v662_v55  ;;  %v3463_v55 = vld [vmem:[#allocation7] ss:$16 sps:$4 sm:$0xff]   ;;  %v3471_v57 = vld [vmem:[#allocation7 + $0x24] ss:$16 sps:$4 sm:$0xff]  }
 0x22d   :  { %2946 = vtanh.f32 %v666_v58  ;;  %v3473_v58 = vld [vmem:[#allocation7 + $0x2c] ss:$16 sps:$4 sm:$0xff]   ;;  %v3483_v59 = vld [vmem:[#allocation7 + $0x44] ss:$16 sps:$4 sm:$0xff]  }
 0x22e   :  { %2948 = vtanh.f32 %v660_v1  ;;  %v3475_v1 = vld [vmem:[#allocation7 + $0x20] ss:$16 sps:$4 sm:$0xff]  }
 0x22f   :  { %2950 = vtanh.f32 %v671_v60  ;;  %v3485_v60 = vld [vmem:[#allocation7 + $0x4c] ss:$16 sps:$4 sm:$0xff]  }
 0x236   :  { %v2945_v61 = vpop.eup %2944 }
 0x237   :  { %v2947_v62 = vpop.eup %2946  ;;  %v664_v63 = vmul.f32 0.5, %v2945_v61  ;;  %v3487_v61 = vld [vmem:[#allocation7 + $0x40] ss:$16 sps:$4 sm:$0xff]  }
 0x238   :  { %v668_v31 = vmul.f32 0.5, %v2947_v62  ;;  %v2949_v36 = vpop.eup %2948  ;;  %v3489_v62 = vld [vmem:[#allocation7 + $0x48] ss:$16 sps:$4 sm:$0xff]  }
 0x239   :  { %v665_v34 = vadd.f32 0.5, %v664_v63  ;;  %v2951_v41 = vpop.eup %2950  ;;  %v3495_v63 = vld [vmem:[#allocation7 + $0x64] ss:$16 sps:$4 sm:$0xff]  }
 0x23a   :  { %v669_v37 = vadd.f32 0.5, %v668_v31  ;;  %v673_v42 = vmul.f32 0.5, %v2951_v41  ;;  %v3497_v31 = vld [vmem:[#allocation7 + $0x6c] ss:$16 sps:$4 sm:$0xff]   ;;  %v3519_v41 = vld [vmem:[#allocation7 + $0xa4] ss:$16 sps:$4 sm:$0xff]  }
 0x23b   :  { %v676_v38 = vmul.f32 %v2949_v36, %v665_v34  ;;  %v3499_v34 = vld [vmem:[#allocation7 + $0x60] ss:$16 sps:$4 sm:$0xff]   ;;  %v3501_v36 = vld [vmem:[#allocation7 + $0x68] ss:$16 sps:$4 sm:$0xff]  }
 0x23c   :  { %v675_v39 = vmul.f32 %v669_v37, %v3380_v35  ;;  %v674_v43 = vadd.f32 0.5, %v673_v42  ;;  %v3507_v37 = vld [vmem:[#allocation7 + $0x84] ss:$16 sps:$4 sm:$0xff]   ;;  %v3521_v42 = vld [vmem:[#allocation7 + $0xac] ss:$16 sps:$4 sm:$0xff]  }
 0x23e   :  { %v3418_v40 = vadd.f32 %v676_v38, %v675_v39  ;;  %v3509_v38 = vld [vmem:[#allocation7 + $0x8c] ss:$16 sps:$4 sm:$0xff]   ;;  %v3511_v39 = vld [vmem:[#allocation7 + $0x80] ss:$16 sps:$4 sm:$0xff]  }
 0x240   :  { %2952 = vtanh.f32 %v3418_v40 }
 0x24a   :  { %v2953_v44 = vpop.eup %2952 }
 0x24b   :  { %v679_v45 = vmul.f32 %v2953_v44, %v674_v43  ;;  %v3523_v43 = vld [vmem:[#allocation7 + $0xa0] ss:$16 sps:$4 sm:$0xff]   ;;  %v3525_v44 = vld [vmem:[#allocation7 + $0xa8] ss:$16 sps:$4 sm:$0xff]  }
 0x24d   :  { %v680_v46 = vpack.c.bf16 %v679_v45, %v679_v45  ;;  %v3531_v45 = vld [vmem:[#allocation7 + $0xc4] ss:$16 sps:$4 sm:$0xff]  }
 0x24f   :  { %682 = vst [vmem:[#allocation10 + $0x4] sm:$0xf] %v680_v46  ;;  %915 = vmatmul.mubr.bf16.vlgmr.msra.gmra.mrb[8].mxu0 %v680_v46  ;;  %956 = vmatmul.mubr.bf16.vlgmr.msra.gmra.mrb[8].mxu1 %v680_v46  ;;  %v3533_v46 = vld [vmem:[#allocation7 + $0xcc] ss:$16 sps:$4 sm:$0xff]  }
 0x250   :  { %1189 = vmatpush1.bf16.msra.mxu0 %v3247_v2  ;;  %1230 = vmatpush1.bf16.msra.mxu1 %v3257_v6  ;;  %v684_v2 = vld [vmem:[#allocation4 + $0x20] sm:$0xff] }
 0x251   :  { %1190 = vmatprep.subr.bf16.mxu0 %v3250_v3  ;;  %1231 = vmatprep.subr.bf16.mxu1 %v3263_v8  ;;  %v686_v3 = vunpack.c.l.bf16 %v684_v2  ;;  %v687_v6 = vunpack.c.h.bf16 %v684_v2  ;;  %v3535_v2 = vld [vmem:[#allocation7 + $0xc0] ss:$16 sps:$4 sm:$0xff]  }
 0x252   :  { %1220 = vmatprep.mubr.bf16.mxu0 %v3159_v0  ;;  %1261 = vmatprep.mubr.bf16.mxu1 %v3159_v0 }
 0x254   :  { %1191 = vmatpush1.bf16.msra.mxu0 %v3255_v5  ;;  %1232 = vmatpush1.bf16.msra.mxu1 %v3266_v9  ;;  %v685_v5 = vld [vmem:[#allocation4 + $0x28] sm:$0xff] }
 0x255   :  { %1192 = vmatprep.subr.bf16.mxu0 %v3260_v7  ;;  %1233 = vmatprep.subr.bf16.mxu1 %v3275_v12 }
 0x258   :  { %1193 = vmatpush1.bf16.msra.mxu0 %v3270_v10  ;;  %1234 = vmatpush1.bf16.msra.mxu1 %v3278_v13  ;;  %v688_v10 = vunpack.c.l.bf16 %v685_v5 }
 0x259   :  { %1194 = vmatprep.subr.bf16.mxu0 %v3273_v11  ;;  %1235 = vmatprep.subr.bf16.mxu1 %v3284_v15 }
 0x25c   :  { %1195 = vmatpush1.bf16.msra.mxu0 %v3282_v14  ;;  %1236 = vmatpush1.bf16.msra.mxu1 %v3292_v18 }
 0x25d   :  { %1196 = vmatprep.subr.bf16.mxu0 %v3287_v16  ;;  %1237 = vmatprep.subr.bf16.mxu1 %v3296_v19 }
 0x260   :  { %1197 = vmatpush1.bf16.msra.mxu0 %v3290_v17  ;;  %1238 = vmatpush1.bf16.msra.mxu1 %v3302_v21  ;;  %v689_v21 = vunpack.c.h.bf16 %v685_v5  ;;  %v3543_v5 = vld [vmem:[#allocation7 + $0xe4] ss:$16 sps:$4 sm:$0xff]  }
 0x261   :  { %1198 = vmatprep.subr.bf16.mxu0 %v3299_v20  ;;  %1239 = vmatprep.subr.bf16.mxu1 %v3308_v23 }
 0x264   :  { %1199 = vmatpush1.bf16.msra.mxu0 %v3306_v22  ;;  %1240 = vmatpush1.bf16.msra.mxu1 %v3315_v26 }
 0x265   :  { %1200 = vmatprep.subr.bf16.mxu0 %v3311_v24  ;;  %1241 = vmatprep.subr.bf16.mxu1 %v3317_v27 }
 0x268   :  { %1201 = vmatpush1.bf16.msra.mxu0 %v3313_v25  ;;  %1242 = vmatpush1.bf16.msra.mxu1 %v3325_v29 }
 0x269   :  { %1202 = vmatprep.subr.bf16.mxu0 %v3320_v28  ;;  %1243 = vmatprep.subr.bf16.mxu1 %v3329_v32 }
 0x26c   :  { %1203 = vmatpush1.bf16.msra.mxu0 %v3327_v30  ;;  %1244 = vmatpush1.bf16.msra.mxu1 %v3335_v33 }
 0x26d   :  { %1494 = vmatprep.subr.bf16.mxu0 %v3459_v53  ;;  %1535 = vmatprep.subr.bf16.mxu1 %v3461_v54 }
 0x322   :  { %v916_v7 = vpop.f32.mrb[8].mxu0  ;;  %v957_v8 = vpop.f32.mrb[8].mxu1 }
 0x323   :  { %v964_v9 = vadd.f32 %v916_v7, %v686_v3  ;;  %v918_v11 = vpop.f32.mrb[9].mxu0  ;;  %v959_v12 = vpop.f32.mrb[9].mxu1  ;;  %v966_v20 = vadd.f32 %v957_v8, %v688_v10  ;;  %v3537_v3 = vld [vmem:[#allocation7 + $0xc8] ss:$16 sps:$4 sm:$0xff]   ;;  %v3547_v7 = vld [vmem:[#allocation7 + $0xe0] ss:$16 sps:$4 sm:$0xff]  }
 0x324   :  { %v965_v13 = vadd.f32 %v918_v11, %v687_v6  ;;  %v920_v14 = vpop.f32.mrb[10].mxu0  ;;  %v961_v15 = vpop.f32.mrb[10].mxu1  ;;  %v967_v22 = vadd.f32 %v959_v12, %v689_v21  ;;  %v3545_v6 = vld [vmem:[#allocation7 + $0xec] ss:$16 sps:$4 sm:$0xff]   ;;  %v3549_v8 = vld [vmem:[#allocation7 + $0xe8] ss:$16 sps:$4 sm:$0xff]  }
 0x325   :  { %v968_v16 = vmul.f32 0.5, %v964_v9  ;;  %v921_v17 = vpop.f32.mrb[11].mxu0  ;;  %v962_v18 = vpop.f32.mrb[11].mxu1  ;;  %v990_v9 = vld [vmem:[#allocation4 + $0x30] sm:$0xff]  ;;  %v991_v11 = vld [vmem:[#allocation4 + $0x38] sm:$0xff] }
 0x326   :  { %v972_v19 = vmul.f32 0.5, %v965_v13  ;;  %v977_v23 = vmul.f32 0.5, %v967_v22  ;;  %v992_v10 = vunpack.c.l.bf16 %v990_v9  ;;  %v993_v12 = vunpack.c.h.bf16 %v990_v9 }
 0x327   :  { %2954 = vtanh.f32 %v968_v16  ;;  %v994_v16 = vunpack.c.l.bf16 %v991_v11 }
 0x328   :  { %2956 = vtanh.f32 %v972_v19 }
 0x329   :  { %2958 = vtanh.f32 %v966_v20 }
 0x32a   :  { %2960 = vtanh.f32 %v977_v23 }
 0x331   :  { %v2955_v24 = vpop.eup %2954 }
 0x332   :  { %v2957_v25 = vpop.eup %2956  ;;  %v970_v26 = vmul.f32 0.5, %v2955_v24 }
 0x333   :  { %v974_v27 = vmul.f32 0.5, %v2957_v25  ;;  %v2959_v29 = vpop.eup %2958 }
 0x334   :  { %v971_v28 = vadd.f32 0.5, %v970_v26  ;;  %v2961_v47 = vpop.eup %2960 }
 0x335   :  { %v975_v30 = vadd.f32 0.5, %v974_v27  ;;  %v979_v48 = vmul.f32 0.5, %v2961_v47  ;;  %v995_v27 = vunpack.c.h.bf16 %v991_v11 }
 0x336   :  { %v982_v32 = vmul.f32 %v2959_v29, %v971_v28 }
 0x337   :  { %v981_v33 = vmul.f32 %v975_v30, %v3418_v40  ;;  %v980_v49 = vadd.f32 0.5, %v979_v48  ;;  %v3513_v40 = vld [vmem:[#allocation7 + $0x88] ss:$16 sps:$4 sm:$0xff]  }
 0x339   :  { %v3454_v35 = vadd.f32 %v982_v32, %v981_v33 }
 0x33b   :  { %2962 = vtanh.f32 %v3454_v35 }
 0x345   :  { %v2963_v50 = vpop.eup %2962 }
 0x346   :  { %v985_v51 = vmul.f32 %v2963_v50, %v980_v49 }
 0x348   :  { %v986_v52 = vpack.c.bf16 %v985_v51, %v985_v51 }
 0x34a   :  { %988 = vst [vmem:[#allocation10 + $0x8] sm:$0xf] %v986_v52  ;;  %1221 = vmatmul.mubr.bf16.vlgmr.msra.gmra.mrb[12].mxu0 %v986_v52  ;;  %1262 = vmatmul.mubr.bf16.vlgmr.msra.gmra.mrb[12].mxu1 %v986_v52 }
 0x34b   :  { %1526 = vmatprep.mubr.bf16.mxu0 %v3159_v0  ;;  %1567 = vmatprep.mubr.bf16.mxu1 %v3159_v0 }
 0x34c   :  { %1495 = vmatpush1.bf16.msra.mxu0 %v3463_v55  ;;  %1536 = vmatpush1.bf16.msra.mxu1 %v3465_v56 }
 0x34d   :  { %1496 = vmatprep.subr.bf16.mxu0 %v3471_v57  ;;  %1537 = vmatprep.subr.bf16.mxu1 %v3473_v58 }
 0x350   :  { %1497 = vmatpush1.bf16.msra.mxu0 %v3475_v1  ;;  %1538 = vmatpush1.bf16.msra.mxu1 %v3477_v4 }
 0x351   :  { %1498 = vmatprep.subr.bf16.mxu0 %v3483_v59  ;;  %1539 = vmatprep.subr.bf16.mxu1 %v3485_v60 }
 0x354   :  { %1499 = vmatpush1.bf16.msra.mxu0 %v3487_v61  ;;  %1540 = vmatpush1.bf16.msra.mxu1 %v3489_v62 }
 0x355   :  { %1500 = vmatprep.subr.bf16.mxu0 %v3495_v63  ;;  %1541 = vmatprep.subr.bf16.mxu1 %v3497_v31 }
 0x358   :  { %1501 = vmatpush1.bf16.msra.mxu0 %v3499_v34  ;;  %1542 = vmatpush1.bf16.msra.mxu1 %v3501_v36 }
 0x359   :  { %1502 = vmatprep.subr.bf16.mxu0 %v3507_v37  ;;  %1543 = vmatprep.subr.bf16.mxu1 %v3509_v38 }
 0x35c   :  { %1503 = vmatpush1.bf16.msra.mxu0 %v3511_v39  ;;  %1544 = vmatpush1.bf16.msra.mxu1 %v3513_v40 }
 0x35d   :  { %1504 = vmatprep.subr.bf16.mxu0 %v3519_v41  ;;  %1545 = vmatprep.subr.bf16.mxu1 %v3521_v42 }
 0x360   :  { %1505 = vmatpush1.bf16.msra.mxu0 %v3523_v43  ;;  %1546 = vmatpush1.bf16.msra.mxu1 %v3525_v44 }
 0x361   :  { %1506 = vmatprep.subr.bf16.mxu0 %v3531_v45  ;;  %1547 = vmatprep.subr.bf16.mxu1 %v3533_v46 }
 0x364   :  { %1507 = vmatpush1.bf16.msra.mxu0 %v3535_v2  ;;  %1548 = vmatpush1.bf16.msra.mxu1 %v3537_v3 }
 0x365   :  { %1508 = vmatprep.subr.bf16.mxu0 %v3543_v5  ;;  %1549 = vmatprep.subr.bf16.mxu1 %v3545_v6 }
 0x368   :  { %1509 = vmatpush1.bf16.msra.mxu0 %v3547_v7  ;;  %1550 = vmatpush1.bf16.msra.mxu1 %v3549_v8 }
 0x369   :  { %1800 = vmatprep.subr.bf16.mxu0 %v3459_v53  ;;  %1841 = vmatprep.subr.bf16.mxu1 %v3461_v54 }
 0x41d   :  { %v1222_v13 = vpop.f32.mrb[12].mxu0  ;;  %v1263_v14 = vpop.f32.mrb[12].mxu1 }
 0x41e   :  { %v1270_v15 = vadd.f32 %v1222_v13, %v992_v10  ;;  %v1224_v17 = vpop.f32.mrb[13].mxu0  ;;  %v1265_v18 = vpop.f32.mrb[13].mxu1  ;;  %v1272_v26 = vadd.f32 %v1263_v14, %v994_v16 }
 0x41f   :  { %v1271_v19 = vadd.f32 %v1224_v17, %v993_v12  ;;  %v1226_v20 = vpop.f32.mrb[14].mxu0  ;;  %v1267_v21 = vpop.f32.mrb[14].mxu1  ;;  %v1273_v28 = vadd.f32 %v1265_v18, %v995_v27  ;;  %v1297_v17 = vld [vmem:[#allocation4 + $0x48] sm:$0xff] }
 0x420   :  { %v1274_v22 = vmul.f32 0.5, %v1270_v15  ;;  %v1227_v23 = vpop.f32.mrb[15].mxu0  ;;  %v1268_v24 = vpop.f32.mrb[15].mxu1 }
 0x421   :  { %v1278_v25 = vmul.f32 0.5, %v1271_v19  ;;  %v1283_v29 = vmul.f32 0.5, %v1273_v28 }
 0x422   :  { %2964 = vtanh.f32 %v1274_v22  ;;  %v1300_v22 = vunpack.c.l.bf16 %v1297_v17 }
 0x423   :  { %2966 = vtanh.f32 %v1278_v25 }
 0x424   :  { %2968 = vtanh.f32 %v1272_v26 }
 0x425   :  { %2970 = vtanh.f32 %v1283_v29 }
 0x42c   :  { %v2965_v30 = vpop.eup %2964 }
 0x42d   :  { %v2967_v32 = vpop.eup %2966  ;;  %v1276_v33 = vmul.f32 0.5, %v2965_v30 }
 0x42e   :  { %v1280_v47 = vmul.f32 0.5, %v2967_v32  ;;  %v2969_v49 = vpop.eup %2968 }
 0x42f   :  { %v1277_v48 = vadd.f32 0.5, %v1276_v33  ;;  %v2971_v10 = vpop.eup %2970 }
 0x430   :  { %v1281_v50 = vadd.f32 0.5, %v1280_v47  ;;  %v1285_v11 = vmul.f32 0.5, %v2971_v10  ;;  %v1301_v47 = vunpack.c.h.bf16 %v1297_v17 }
 0x431   :  { %v1288_v51 = vmul.f32 %v2969_v49, %v1277_v48 }
 0x432   :  { %v1287_v52 = vmul.f32 %v1281_v50, %v3454_v35  ;;  %v1286_v12 = vadd.f32 0.5, %v1285_v11  ;;  %v1296_v35 = vld [vmem:[#allocation4 + $0x40] sm:$0xff] }
 0x433   :  { %v1298_v16 = vunpack.c.l.bf16 %v1296_v35  ;;  %v1299_v18 = vunpack.c.h.bf16 %v1296_v35 }
 0x434   :  { %v3558_v9 = vadd.f32 %v1288_v51, %v1287_v52 }
 0x436   :  { %2972 = vtanh.f32 %v3558_v9 }
 0x440   :  { %v2973_v13 = vpop.eup %2972 }
 0x441   :  { %v1291_v14 = vmul.f32 %v2973_v13, %v1286_v12 }
 0x443   :  { %v1292_v15 = vpack.c.bf16 %v1291_v14, %v1291_v14 }
 0x445   :  { %1294 = vst [vmem:[#allocation10 + $0xc] sm:$0xf] %v1292_v15  ;;  %1527 = vmatmul.mubr.bf16.vlgmr.msra.gmra.mrb[16].mxu0 %v1292_v15  ;;  %1568 = vmatmul.mubr.bf16.vlgmr.msra.gmra.mrb[16].mxu1 %v1292_v15 }
 0x446   :  { %1801 = vmatpush1.bf16.msra.mxu0 %v3463_v55  ;;  %1842 = vmatpush1.bf16.msra.mxu1 %v3465_v56 }
 0x447   :  { %1802 = vmatprep.subr.bf16.mxu0 %v3471_v57  ;;  %1843 = vmatprep.subr.bf16.mxu1 %v3473_v58 }
 0x448   :  { %1832 = vmatprep.mubr.bf16.mxu0 %v3159_v0  ;;  %1873 = vmatprep.mubr.bf16.mxu1 %v3159_v0 }
 0x44a   :  { %1803 = vmatpush1.bf16.msra.mxu0 %v3475_v1  ;;  %1844 = vmatpush1.bf16.msra.mxu1 %v3477_v4 }
 0x44b   :  { %1804 = vmatprep.subr.bf16.mxu0 %v3483_v59  ;;  %1845 = vmatprep.subr.bf16.mxu1 %v3485_v60 }
 0x44e   :  { %1805 = vmatpush1.bf16.msra.mxu0 %v3487_v61  ;;  %1846 = vmatpush1.bf16.msra.mxu1 %v3489_v62 }
 0x44f   :  { %1806 = vmatprep.subr.bf16.mxu0 %v3495_v63  ;;  %1847 = vmatprep.subr.bf16.mxu1 %v3497_v31 }
 0x452   :  { %1807 = vmatpush1.bf16.msra.mxu0 %v3499_v34  ;;  %1848 = vmatpush1.bf16.msra.mxu1 %v3501_v36 }
 0x453   :  { %1808 = vmatprep.subr.bf16.mxu0 %v3507_v37  ;;  %1849 = vmatprep.subr.bf16.mxu1 %v3509_v38 }
 0x456   :  { %1809 = vmatpush1.bf16.msra.mxu0 %v3511_v39  ;;  %1850 = vmatpush1.bf16.msra.mxu1 %v3513_v40 }
 0x457   :  { %1810 = vmatprep.subr.bf16.mxu0 %v3519_v41  ;;  %1851 = vmatprep.subr.bf16.mxu1 %v3521_v42 }
 0x45a   :  { %1811 = vmatpush1.bf16.msra.mxu0 %v3523_v43  ;;  %1852 = vmatpush1.bf16.msra.mxu1 %v3525_v44 }
 0x45b   :  { %1812 = vmatprep.subr.bf16.mxu0 %v3531_v45  ;;  %1853 = vmatprep.subr.bf16.mxu1 %v3533_v46 }
 0x45e   :  { %1813 = vmatpush1.bf16.msra.mxu0 %v3535_v2  ;;  %1854 = vmatpush1.bf16.msra.mxu1 %v3537_v3 }
 0x45f   :  { %1814 = vmatprep.subr.bf16.mxu0 %v3543_v5  ;;  %1855 = vmatprep.subr.bf16.mxu1 %v3545_v6 }
 0x462   :  { %1815 = vmatpush1.bf16.msra.mxu0 %v3547_v7  ;;  %1856 = vmatpush1.bf16.msra.mxu1 %v3549_v8 }
 0x463   :  { %2106 = vmatprep.subr.bf16.mxu0 %v3459_v53  ;;  %2147 = vmatprep.subr.bf16.mxu1 %v3461_v54 }
 0x518   :  { %v1528_v19 = vpop.f32.mrb[16].mxu0  ;;  %v1569_v20 = vpop.f32.mrb[16].mxu1 }
 0x519   :  { %v1576_v21 = vadd.f32 %v1528_v19, %v1298_v16  ;;  %v1530_v23 = vpop.f32.mrb[17].mxu0  ;;  %v1571_v24 = vpop.f32.mrb[17].mxu1  ;;  %v1578_v33 = vadd.f32 %v1569_v20, %v1300_v22 }
 0x51a   :  { %v1577_v25 = vadd.f32 %v1530_v23, %v1299_v18  ;;  %v1532_v26 = vpop.f32.mrb[18].mxu0  ;;  %v1573_v27 = vpop.f32.mrb[18].mxu1  ;;  %v1579_v48 = vadd.f32 %v1571_v24, %v1301_v47  ;;  %v1603_v23 = vld [vmem:[#allocation4 + $0x58] sm:$0xff] }
 0x51b   :  { %v1580_v28 = vmul.f32 0.5, %v1576_v21  ;;  %v1533_v29 = vpop.f32.mrb[19].mxu0  ;;  %v1574_v30 = vpop.f32.mrb[19].mxu1 }
 0x51c   :  { %v1584_v32 = vmul.f32 0.5, %v1577_v25  ;;  %v1589_v49 = vmul.f32 0.5, %v1579_v48 }
 0x51d   :  { %2974 = vtanh.f32 %v1580_v28  ;;  %v1606_v28 = vunpack.c.l.bf16 %v1603_v23 }
 0x51e   :  { %2976 = vtanh.f32 %v1584_v32 }
 0x51f   :  { %2978 = vtanh.f32 %v1578_v33 }
 0x520   :  { %2980 = vtanh.f32 %v1589_v49 }
 0x527   :  { %v2975_v50 = vpop.eup %2974 }
 0x528   :  { %v2977_v51 = vpop.eup %2976  ;;  %v1582_v52 = vmul.f32 0.5, %v2975_v50 }
 0x529   :  { %v1586_v10 = vmul.f32 0.5, %v2977_v51  ;;  %v2979_v12 = vpop.eup %2978 }
 0x52a   :  { %v1583_v11 = vadd.f32 0.5, %v1582_v52  ;;  %v2981_v16 = vpop.eup %2980 }
 0x52b   :  { %v1587_v13 = vadd.f32 0.5, %v1586_v10  ;;  %v1591_v17 = vmul.f32 0.5, %v2981_v16 }
 0x52c   :  { %v1594_v14 = vmul.f32 %v2979_v12, %v1583_v11 }
 0x52d   :  { %v1593_v15 = vmul.f32 %v1587_v13, %v3558_v9  ;;  %v1592_v18 = vadd.f32 0.5, %v1591_v17  ;;  %v1602_v9 = vld [vmem:[#allocation4 + $0x50] sm:$0xff] }
 0x52e   :  { %v1604_v22 = vunpack.c.l.bf16 %v1602_v9  ;;  %v1605_v24 = vunpack.c.h.bf16 %v1602_v9 }
 0x52f   :  { %v3596_v35 = vadd.f32 %v1594_v14, %v1593_v15 }
 0x531   :  { %2982 = vtanh.f32 %v3596_v35 }
 0x53b   :  { %v2983_v19 = vpop.eup %2982 }
 0x53c   :  { %v1597_v20 = vmul.f32 %v2983_v19, %v1592_v18 }
 0x53e   :  { %v1598_v21 = vpack.c.bf16 %v1597_v20, %v1597_v20 }
 0x540   :  { %1600 = vst [vmem:[#allocation10 + $0x10] sm:$0xf] %v1598_v21  ;;  %1833 = vmatmul.mubr.bf16.vlgmr.msra.gmra.mrb[20].mxu0 %v1598_v21  ;;  %1874 = vmatmul.mubr.bf16.vlgmr.msra.gmra.mrb[20].mxu1 %v1598_v21 }
 0x541   :  { %2107 = vmatpush1.bf16.msra.mxu0 %v3463_v55  ;;  %2148 = vmatpush1.bf16.msra.mxu1 %v3465_v56 }
 0x542   :  { %2108 = vmatprep.subr.bf16.mxu0 %v3471_v57  ;;  %2149 = vmatprep.subr.bf16.mxu1 %v3473_v58 }
 0x543   :  { %2138 = vmatprep.mubr.bf16.mxu0 %v3159_v0  ;;  %2179 = vmatprep.mubr.bf16.mxu1 %v3159_v0 }
 0x545   :  { %2109 = vmatpush1.bf16.msra.mxu0 %v3475_v1  ;;  %2150 = vmatpush1.bf16.msra.mxu1 %v3477_v4 }
 0x546   :  { %2110 = vmatprep.subr.bf16.mxu0 %v3483_v59  ;;  %2151 = vmatprep.subr.bf16.mxu1 %v3485_v60 }
 0x549   :  { %2111 = vmatpush1.bf16.msra.mxu0 %v3487_v61  ;;  %2152 = vmatpush1.bf16.msra.mxu1 %v3489_v62 }
 0x54a   :  { %2112 = vmatprep.subr.bf16.mxu0 %v3495_v63  ;;  %2153 = vmatprep.subr.bf16.mxu1 %v3497_v31 }
 0x54d   :  { %2113 = vmatpush1.bf16.msra.mxu0 %v3499_v34  ;;  %2154 = vmatpush1.bf16.msra.mxu1 %v3501_v36 }
 0x54e   :  { %2114 = vmatprep.subr.bf16.mxu0 %v3507_v37  ;;  %2155 = vmatprep.subr.bf16.mxu1 %v3509_v38 }
 0x551   :  { %2115 = vmatpush1.bf16.msra.mxu0 %v3511_v39  ;;  %2156 = vmatpush1.bf16.msra.mxu1 %v3513_v40 }
 0x552   :  { %2116 = vmatprep.subr.bf16.mxu0 %v3519_v41  ;;  %2157 = vmatprep.subr.bf16.mxu1 %v3521_v42 }
 0x555   :  { %2117 = vmatpush1.bf16.msra.mxu0 %v3523_v43  ;;  %2158 = vmatpush1.bf16.msra.mxu1 %v3525_v44 }
 0x556   :  { %2118 = vmatprep.subr.bf16.mxu0 %v3531_v45  ;;  %2159 = vmatprep.subr.bf16.mxu1 %v3533_v46 }
 0x559   :  { %2119 = vmatpush1.bf16.msra.mxu0 %v3535_v2  ;;  %2160 = vmatpush1.bf16.msra.mxu1 %v3537_v3 }
 0x55a   :  { %2120 = vmatprep.subr.bf16.mxu0 %v3543_v5  ;;  %2161 = vmatprep.subr.bf16.mxu1 %v3545_v6 }
 0x55d   :  { %2121 = vmatpush1.bf16.msra.mxu0 %v3547_v7  ;;  %2162 = vmatpush1.bf16.msra.mxu1 %v3549_v8 }
 0x55e   :  { %2412 = vmatprep.subr.bf16.mxu0 %v3459_v53  ;;  %2453 = vmatprep.subr.bf16.mxu1 %v3461_v54  ;;  %v1607_v54 = vunpack.c.h.bf16 %v1603_v23 }
 0x613   :  { %v1834_v25 = vpop.f32.mrb[20].mxu0  ;;  %v1875_v26 = vpop.f32.mrb[20].mxu1 }
 0x614   :  { %v1882_v27 = vadd.f32 %v1834_v25, %v1604_v22  ;;  %v1836_v29 = vpop.f32.mrb[21].mxu0  ;;  %v1877_v30 = vpop.f32.mrb[21].mxu1  ;;  %v1884_v53 = vadd.f32 %v1875_v26, %v1606_v28 }
 0x615   :  { %v1883_v32 = vadd.f32 %v1836_v29, %v1605_v24  ;;  %v1838_v33 = vpop.f32.mrb[22].mxu0  ;;  %v1879_v47 = vpop.f32.mrb[22].mxu1  ;;  %v1885_v52 = vadd.f32 %v1877_v30, %v1607_v54 }
 0x616   :  { %v1886_v48 = vmul.f32 0.5, %v1882_v27  ;;  %v1839_v49 = vpop.f32.mrb[23].mxu0  ;;  %v1880_v50 = vpop.f32.mrb[23].mxu1  ;;  %v2215_v47 = vld [vmem:[#allocation4 + $0x78] sm:$0xff] }
 0x617   :  { %v1890_v51 = vmul.f32 0.5, %v1883_v32  ;;  %v1895_v10 = vmul.f32 0.5, %v1885_v52  ;;  %v2214_v32 = vld [vmem:[#allocation4 + $0x70] sm:$0xff] }
 0x618   :  { %2984 = vtanh.f32 %v1886_v48  ;;  %v2216_v33 = vunpack.c.l.bf16 %v2214_v32  ;;  %v2217_v48 = vunpack.c.h.bf16 %v2214_v32 }
 0x619   :  { %2986 = vtanh.f32 %v1890_v51 }
 0x61a   :  { %2988 = vtanh.f32 %v1884_v53  ;;  %v2218_v53 = vunpack.c.l.bf16 %v2215_v47 }
 0x61b   :  { %2990 = vtanh.f32 %v1895_v10 }
 0x622   :  { %v2985_v11 = vpop.eup %2984 }
 0x623   :  { %v2987_v12 = vpop.eup %2986  ;;  %v1888_v13 = vmul.f32 0.5, %v2985_v11 }
 0x624   :  { %v1892_v14 = vmul.f32 0.5, %v2987_v12  ;;  %v2989_v16 = vpop.eup %2988 }
 0x625   :  { %v1889_v15 = vadd.f32 0.5, %v1888_v13  ;;  %v2991_v21 = vpop.eup %2990 }
 0x626   :  { %v1893_v17 = vadd.f32 0.5, %v1892_v14  ;;  %v1897_v9 = vmul.f32 0.5, %v2991_v21 }
 0x627   :  { %v1900_v18 = vmul.f32 %v2989_v16, %v1889_v15 }
 0x628   :  { %v1899_v19 = vmul.f32 %v1893_v17, %v3596_v35  ;;  %v1898_v22 = vadd.f32 0.5, %v1897_v9 }
 0x62a   :  { %v3634_v20 = vadd.f32 %v1900_v18, %v1899_v19  ;;  %v2219_v18 = vunpack.c.h.bf16 %v2215_v47 }
 0x62c   :  { %2992 = vtanh.f32 %v3634_v20 }
 0x636   :  { %v2993_v23 = vpop.eup %2992 }
 0x637   :  { %v1903_v24 = vmul.f32 %v2993_v23, %v1898_v22 }
 0x639   :  { %v1904_v25 = vpack.c.bf16 %v1903_v24, %v1903_v24 }
 0x63b   :  { %1906 = vst [vmem:[#allocation10 + $0x14] sm:$0xf] %v1904_v25  ;;  %2139 = vmatmul.mubr.bf16.vlgmr.msra.gmra.mrb[24].mxu0 %v1904_v25  ;;  %2180 = vmatmul.mubr.bf16.vlgmr.msra.gmra.mrb[24].mxu1 %v1904_v25 }
 0x63c   :  { %2413 = vmatpush1.bf16.msra.mxu0 %v3463_v55  ;;  %2454 = vmatpush1.bf16.msra.mxu1 %v3465_v56  ;;  %v1909_v56 = vld [vmem:[#allocation4 + $0x68] sm:$0xff] }
 0x63d   :  { %2414 = vmatprep.subr.bf16.mxu0 %v3471_v57  ;;  %2455 = vmatprep.subr.bf16.mxu1 %v3473_v58 }
 0x63e   :  { %2444 = vmatprep.mubr.bf16.mxu0 %v3159_v0  ;;  %2485 = vmatprep.mubr.bf16.mxu1 %v3159_v0  ;;  %v1908_v0 = vld [vmem:[#allocation4 + $0x60] sm:$0xff] }
 0x63f   :  { %v1910_v55 = vunpack.c.l.bf16 %v1908_v0  ;;  %v1911_v57 = vunpack.c.h.bf16 %v1908_v0 }
 0x640   :  { %2415 = vmatpush1.bf16.msra.mxu0 %v3475_v1  ;;  %2456 = vmatpush1.bf16.msra.mxu1 %v3477_v4 }
 0x641   :  { %2416 = vmatprep.subr.bf16.mxu0 %v3483_v59  ;;  %2457 = vmatprep.subr.bf16.mxu1 %v3485_v60  ;;  %v1912_v59 = vunpack.c.l.bf16 %v1909_v56 }
 0x644   :  { %2417 = vmatpush1.bf16.msra.mxu0 %v3487_v61  ;;  %2458 = vmatpush1.bf16.msra.mxu1 %v3489_v62 }
 0x645   :  { %2418 = vmatprep.subr.bf16.mxu0 %v3495_v63  ;;  %2459 = vmatprep.subr.bf16.mxu1 %v3497_v31 }
 0x648   :  { %2419 = vmatpush1.bf16.msra.mxu0 %v3499_v34  ;;  %2460 = vmatpush1.bf16.msra.mxu1 %v3501_v36 }
 0x649   :  { %2420 = vmatprep.subr.bf16.mxu0 %v3507_v37  ;;  %2461 = vmatprep.subr.bf16.mxu1 %v3509_v38 }
 0x64c   :  { %2421 = vmatpush1.bf16.msra.mxu0 %v3511_v39  ;;  %2462 = vmatpush1.bf16.msra.mxu1 %v3513_v40  ;;  %v1913_v40 = vunpack.c.h.bf16 %v1909_v56 }
 0x64d   :  { %2422 = vmatprep.subr.bf16.mxu0 %v3519_v41  ;;  %2463 = vmatprep.subr.bf16.mxu1 %v3521_v42 }
 0x650   :  { %2423 = vmatpush1.bf16.msra.mxu0 %v3523_v43  ;;  %2464 = vmatpush1.bf16.msra.mxu1 %v3525_v44 }
 0x651   :  { %2424 = vmatprep.subr.bf16.mxu0 %v3531_v45  ;;  %2465 = vmatprep.subr.bf16.mxu1 %v3533_v46 }
 0x654   :  { %2425 = vmatpush1.bf16.msra.mxu0 %v3535_v2  ;;  %2466 = vmatpush1.bf16.msra.mxu1 %v3537_v3 }
 0x655   :  { %2426 = vmatprep.subr.bf16.mxu0 %v3543_v5  ;;  %2467 = vmatprep.subr.bf16.mxu1 %v3545_v6 }
 0x658   :  { %2427 = vmatpush1.bf16.msra.mxu0 %v3547_v7  ;;  %2468 = vmatpush1.bf16.msra.mxu1 %v3549_v8 }
 0x70e   :  { %v2140_v58 = vpop.f32.mrb[24].mxu0  ;;  %v2181_v1 = vpop.f32.mrb[24].mxu1 }
 0x70f   :  { %v2188_v4 = vadd.f32 %v2140_v58, %v1910_v55  ;;  %v2142_v60 = vpop.f32.mrb[25].mxu0  ;;  %v2183_v61 = vpop.f32.mrb[25].mxu1  ;;  %v2190_v39 = vadd.f32 %v2181_v1, %v1912_v59 }
 0x710   :  { %v2189_v62 = vadd.f32 %v2142_v60, %v1911_v57  ;;  %v2144_v63 = vpop.f32.mrb[26].mxu0  ;;  %v2185_v31 = vpop.f32.mrb[26].mxu1  ;;  %v2191_v41 = vadd.f32 %v2183_v61, %v1913_v40 }
 0x711   :  { %v2192_v34 = vmul.f32 0.5, %v2188_v4  ;;  %v2145_v36 = vpop.f32.mrb[27].mxu0  ;;  %v2186_v37 = vpop.f32.mrb[27].mxu1 }
 0x712   :  { %v2196_v38 = vmul.f32 0.5, %v2189_v62  ;;  %v2201_v42 = vmul.f32 0.5, %v2191_v41 }
 0x713   :  { %2994 = vtanh.f32 %v2192_v34 }
 0x714   :  { %2996 = vtanh.f32 %v2196_v38 }
 0x715   :  { %2998 = vtanh.f32 %v2190_v39 }
 0x716   :  { %3000 = vtanh.f32 %v2201_v42 }
 0x71d   :  { %v2995_v43 = vpop.eup %2994 }
 0x71e   :  { %v2997_v44 = vpop.eup %2996  ;;  %v2194_v45 = vmul.f32 0.5, %v2995_v43 }
 0x71f   :  { %v2198_v46 = vmul.f32 0.5, %v2997_v44  ;;  %v2999_v3 = vpop.eup %2998 }
 0x720   :  { %v2195_v2 = vadd.f32 0.5, %v2194_v45  ;;  %v3001_v35 = vpop.eup %3000 }
 0x721   :  { %v2199_v5 = vadd.f32 0.5, %v2198_v46  ;;  %v2203_v26 = vmul.f32 0.5, %v3001_v35 }
 0x722   :  { %v2206_v6 = vmul.f32 %v2999_v3, %v2195_v2 }
 0x723   :  { %v2205_v7 = vmul.f32 %v2199_v5, %v3634_v20  ;;  %v2204_v27 = vadd.f32 0.5, %v2203_v26 }
 0x725   :  { %v2207_v8 = vadd.f32 %v2206_v6, %v2205_v7 }
 0x727   :  { %3002 = vtanh.f32 %v2207_v8 }
 0x731   :  { %v3003_v28 = vpop.eup %3002 }
 0x732   :  { %v2209_v29 = vmul.f32 %v3003_v28, %v2204_v27 }
 0x734   :  { %v2210_v30 = vpack.c.bf16 %v2209_v29, %v2209_v29 }
 0x736   :  { %2212 = vst [vmem:[#allocation10 + $0x18] sm:$0xf] %v2210_v30  ;;  %2445 = vmatmul.mubr.bf16.vlgmr.msra.gmra.mrb[28].mxu0 %v2210_v30  ;;  %2486 = vmatmul.mubr.bf16.vlgmr.msra.gmra.mrb[28].mxu1 %v2210_v30 }
 0x809   :  { %v2446_v49 = vpop.f32.mrb[28].mxu0  ;;  %v2487_v50 = vpop.f32.mrb[28].mxu1 }
 0x80a   :  { %v2494_v51 = vadd.f32 %v2446_v49, %v2216_v33  ;;  %v2448_v54 = vpop.f32.mrb[29].mxu0  ;;  %v2489_v52 = vpop.f32.mrb[29].mxu1  ;;  %v2496_v17 = vadd.f32 %v2487_v50, %v2218_v53 }
 0x80b   :  { %v2495_v10 = vadd.f32 %v2448_v54, %v2217_v48  ;;  %v2450_v11 = vpop.f32.mrb[30].mxu0  ;;  %v2491_v12 = vpop.f32.mrb[30].mxu1  ;;  %v2497_v19 = vadd.f32 %v2489_v52, %v2219_v18 }
 0x80c   :  { %v2498_v13 = vmul.f32 0.5, %v2494_v51  ;;  %v2451_v14 = vpop.f32.mrb[31].mxu0  ;;  %v2492_v15 = vpop.f32.mrb[31].mxu1 }
 0x80d   :  { %v2502_v16 = vmul.f32 0.5, %v2495_v10  ;;  %v2507_v20 = vmul.f32 0.5, %v2497_v19 }
 0x80e   :  { %3004 = vtanh.f32 %v2498_v13 }
 0x80f   :  { %3006 = vtanh.f32 %v2502_v16 }
 0x810   :  { %3008 = vtanh.f32 %v2496_v17 }
 0x811   :  { %3010 = vtanh.f32 %v2507_v20 }
 0x818   :  { %v3005_v21 = vpop.eup %3004 }
 0x819   :  { %v3007_v9 = vpop.eup %3006  ;;  %v2500_v22 = vmul.f32 0.5, %v3005_v21 }
 0x81a   :  { %v2504_v23 = vmul.f32 0.5, %v3007_v9  ;;  %v3009_v25 = vpop.eup %3008 }
 0x81b   :  { %v2501_v24 = vadd.f32 0.5, %v2500_v22  ;;  %v3011_v58 = vpop.eup %3010 }
 0x81c   :  { %v2505_v0 = vadd.f32 0.5, %v2504_v23  ;;  %v2509_v1 = vmul.f32 0.5, %v3011_v58 }
 0x81d   :  { %v2512_v55 = vmul.f32 %v3009_v25, %v2501_v24 }
 0x81e   :  { %v2511_v56 = vmul.f32 %v2505_v0, %v2207_v8  ;;  %v2510_v4 = vadd.f32 0.5, %v2509_v1 }
 0x820   :  { %v2513_v57 = vadd.f32 %v2512_v55, %v2511_v56 }
 0x822   :  { %3012 = vtanh.f32 %v2513_v57  ;;  %2525 = vst [vmem:[#allocation13] sm:$0xff] %v2513_v57 }
 0x82c   :  { %v3013_v59 = vpop.eup %3012 }
 0x82d   :  { %v2515_v60 = vmul.f32 %v3013_v59, %v2510_v4 }
 0x82f   :  { %v2516_v61 = vpack.c.bf16 %v2515_v60, %v2515_v60  ;;  %2524 = vst [vmem:[#allocation11] sm:$0xff] %v2515_v60 }
 0x830   :  { %3091 = shalt.err (!%p3088_p0)
}
 0x831   :  { %s3092_s18 = scalar_lea.hbm %s3725_s5, 128 }
 0x832   :  { %p3093_p1 = scmp.ne.s32.totalorder %s3725_s5, %s3092_s18  ;;  %p3096_p2 = scmp.lt.u32.totalorder %s3092_s18, %s3725_s5 }
 0x834   :  { %p3098_p3 = pnand %p3096_p2, %p3093_p1 }
 0x836   :  { %3101 = shalt.err (!%p3098_p3)
}
 0x837   :  { %2547 = dma.vmem_to_hbm [thread:$0]  %s2545_s10, 128, %s3725_s5, [#allocation12]   ;;  %2518 = vst [vmem:[#allocation10 + $0x1c] sm:$0xf] %v2516_v61 }
 0x838   :  { %s3102_s25 = scalar_lea.vmem %s3672_s14, 128  ;;  %p3107_p5 = scmp.lt.s32.totalorder %s3672_s14, %s3672_s14 }
 0x839   :  { %p3103_p4 = scmp.ne.s32.totalorder %s3672_s14, %s3102_s25  ;;  %p3108_p6 = scmp.lt.s32.totalorder %s3102_s25, %s3102_s25 }
 0x83b   :  { %p3109_p7 = por %p3108_p6, %p3107_p5 }
 0x83d   :  { %p3110_p8 = pnand %p3109_p7, %p3103_p4 }
 0x83f   :  { %3113 = shalt.err (!%p3110_p8)
}
 0x840   :  { %s3114_s28 = scalar_lea.hbm %s3726_s6, 128 }
 0x841   :  { %p3115_p9 = scmp.ne.s32.totalorder %s3726_s6, %s3114_s28  ;;  %p3118_p10 = scmp.lt.u32.totalorder %s3114_s28, %s3726_s6 }
 0x843   :  { %p3120_p11 = pnand %p3118_p10, %p3115_p9 }
 0x845   :  { %3123 = shalt.err (!%p3120_p11)
}
 0x846   :  { %2557 = dma.vmem_to_hbm [thread:$0]  %s3672_s14, 128, %s3726_s6, [#allocation12]  }
 0x847   :  { %s3124_s24 = scalar_lea.vmem %s3670_s12, 512  ;;  %p3129_p13 = scmp.lt.s32.totalorder %s3670_s12, %s3670_s12 }
 0x848   :  { %p3125_p12 = scmp.ne.s32.totalorder %s3670_s12, %s3124_s24  ;;  %p3130_p0 = scmp.lt.s32.totalorder %s3124_s24, %s3124_s24 }
 0x84a   :  { %p3131_p1 = por %p3130_p0, %p3129_p13 }
 0x84c   :  { %p3132_p2 = pnand %p3131_p1, %p3125_p12 }
 0x84e   :  { %3135 = shalt.err (!%p3132_p2)
}
 0x84f   :  { %s3136_s3 = scalar_lea.hbm %s3724_s4, 512 }
 0x850   :  { %p3137_p3 = scmp.ne.s32.totalorder %s3724_s4, %s3136_s3  ;;  %p3140_p4 = scmp.lt.u32.totalorder %s3136_s3, %s3724_s4 }
 0x852   :  { %p3142_p5 = pnand %p3140_p4, %p3137_p3 }
 0x854   :  { %3145 = shalt.err (!%p3142_p5)
}
 0x855   :  { %s3163_s6 = smov 64   ;;  %s3164_s14 = smov 4  }
 0x856   :  { %2537 = dma.vmem_to_hbm [thread:$0]  %s3670_s12, 512, %s3724_s4, [#allocation6], %s3163_s6, %s3163_s6, %s3164_s14  }
 0x857   :  { %3150 = dma.done.wait [#allocation6], 512  }
 0x858   :  { %3151 = vsyncadd [#allocation6], 4294966784 }
 0x859   :  { %3152 = dma.done.wait [#allocation12], 256  }
 0x85a   :  { %3153 = vsyncadd [#allocation12], 4294967040 }
 0x85b   :  { %2567 = vsyncpa [#allocation5], 1 }
 0x85c   :  { %2568 = vsyncpa [#allocation8], 1 }
 0x85d   :  { %2569 = vsyncpa [#allocation6], 1 }
 0x85e   :  { %2570 = vsyncpa [#allocation12], 1 }

</bundles_post_ra>
